<compile_context>
chip_gen: v5e
topology: v5e:2x2
jax: 0.10.0
libtpu: 0.0.40
codegen_flags: <defaults>
</compile_context>

<pallas_src>
import functools

import jax
import jax.numpy as jnp
from jax.experimental import pallas as pl
from jax.experimental.pallas import tpu as pltpu


def _attention_kernel(q_ref, k_ref, v_ref, win_ref, bin_ref, wout_ref,
                      bout_ref, o_ref, *, block_b, seq_len, heads, dim_head,
                      scale, variant, ln_eps, cosine_eps, compute_dtype,
                      approx_recip):
    f32 = jnp.float32
    rows = block_b * seq_len

    w_in = win_ref[...]                  # (heads, dim, dim_head) compute_dtype
    b_in = bin_ref[...].astype(f32)      # (heads, dim_head)      f32
    w_out = wout_ref[...]                # (heads, dim_head, dim) compute_dtype
    b_out = bout_ref[...].astype(f32)    # (1, dim)               f32

    def project(x_ref):
        # LayerNorm (affine folded into w_in / b_in at wrapper time) + linear,
        # emitted directly in head-major batch order: (block_b*heads, N, d).
        x = x_ref[...].astype(f32)                            # (rows, dim)
        mu = jnp.mean(x, axis=-1, keepdims=True)
        var = jnp.mean(jnp.square(x - mu), axis=-1, keepdims=True)
        xhat = ((x - mu) * jax.lax.rsqrt(var + ln_eps)).astype(compute_dtype)
        per_head = [
            jnp.dot(xhat, w_in[h], preferred_element_type=f32)
            + b_in[h][None, :]
            for h in range(heads)                 # heads is static (unrolled)
        ]                                         # each (rows, dim_head) f32
        stacked = jnp.concatenate(per_head, axis=0)     # (heads*rows, d)
        return stacked.reshape(heads * block_b, seq_len, dim_head)

    f_q = project(q_ref)                          # (HB, N, d) f32
    f_k = project(k_ref)
    f_v = project(v_ref)

    if variant == 'cosine':
        # Fold cosine normalisation into q / k before the score matmul:
        # (q/||q||) @ (k/||k||)^T == (q k^T) / (||q|| ||k||).
        f_q = f_q * jax.lax.rsqrt(
            jnp.sum(f_q * f_q, axis=-1, keepdims=True) + cosine_eps)
        f_k = f_k * jax.lax.rsqrt(
            jnp.sum(f_k * f_k, axis=-1, keepdims=True) + cosine_eps)

    # Single batched score einsum over block_b*heads (batch axis leading).
    s = jnp.einsum('bnd,bmd->bnm', f_q.astype(compute_dtype),
                   f_k.astype(compute_dtype),
                   preferred_element_type=f32)    # (HB, N, N) f32
    if variant == 'cosine':
        attn = s                                  # already cosine similarity
    else:
        s = s * scale
        m = jnp.max(s, axis=-1, keepdims=True)
        e = jnp.exp(s - m)
        attn = e * pl.reciprocal(jnp.sum(e, axis=-1, keepdims=True),
                                 approx=approx_recip)

    out = jnp.einsum('bnm,bmd->bnd', attn.astype(compute_dtype),
                     f_v.astype(compute_dtype),
                     preferred_element_type=f32)  # (HB, N, d) f32

    # Output projection: y = sum_h out_h @ w_out_h + b_out. One small matmul
    # per head; contributions accumulate in f32 registers (no VMEM scratch).
    acc = None
    for h in range(heads):
        oh = out[h * block_b:(h + 1) * block_b].reshape(rows, dim_head)
        t = jnp.dot(oh.astype(compute_dtype), w_out[h],
                    preferred_element_type=f32)   # (rows, dim)
        acc = t if acc is None else acc + t
    o_ref[...] = (acc + b_out).astype(o_ref.dtype)


def _device_kind():
    try:
        return jax.devices()[0].device_kind.lower()
    except Exception:
        return ""


def _pick_block_b(B, N, dim, heads, dim_head, in_bytes, compute_bytes, *,
                  vmem_budget, min_steps, row_align):
    """Largest block_b whose per-step VMEM estimate fits the budget."""
    inner = heads * dim_head

    def feasible(cand, align):
        if B % cand:
            return False
        if B // cand < min(min_steps, B):          # keep all TCs busy (v7x)
            return False
        rows = cand * N
        if rows % align and rows != B * N:
            return False
        hb = cand * heads
        est = (3 * 2 * rows * dim * in_bytes            # q/k/v double-buffered
               + 2 * rows * dim * 4                     # output double-buffered
               + 2 * (2 * dim * inner) * compute_bytes  # resident weights
               + 3 * rows * dim * 4                     # f32 normalised copies
               + 3 * rows * inner * 4                   # f_q / f_k / f_v
               + 3 * hb * N * N * 4                     # scores / exp / attn
               + rows * inner * 4                       # attention output
               + 2 * rows * dim * 4)                    # output-proj temps
        return est <= vmem_budget

    for align in (row_align, 8):
        best = None
        for cand in range(1, B + 1):
            if feasible(cand, align):
                best = cand
        if best is not None:
            return best
    return B


def attention_forward(q, k, v, params, *, heads, dim_head, variant='cosine',
                      ln_eps=1e-5, cosine_eps=1e-12, compute_dtype=None,
                      block_b=None, approx_recip=None):
    B, N, dim = q.shape
    inner_dim = heads * dim_head
    f32 = jnp.float32

    kind = _device_kind()
    is_v7 = 'v7' in kind
    if compute_dtype is None:
        # bf16 MXU operands on v6e/v7x (full-rate MXU, smaller VMEM working
        # set); f32 on v5e (no bf16 VPU, pack/unpack costs VALU slots).
        compute_dtype = jnp.bfloat16 if ('v6' in kind or is_v7) else f32
    compute_bytes = jnp.dtype(compute_dtype).itemsize
    in_bytes = jnp.dtype(q.dtype).itemsize
    if approx_recip is None:
        # exact reciprocal on the f32 path (keeps 1e-4 parity), EUP approx on
        # the low-precision path.
        approx_recip = compute_dtype != f32

    # VMEM: v7x has 64 MiB per TensorCore, v5e/v6e 128 MiB.
    vmem_limit = (32 << 20) if is_v7 else (64 << 20)
    min_steps = 2 if is_v7 else 1               # shard the grid over both TCs
    row_align = 16 if compute_bytes < 4 else 8

    if block_b is None:
        block_b = _pick_block_b(B, N, dim, heads, dim_head, in_bytes,
                                compute_bytes, vmem_budget=vmem_limit // 2,
                                min_steps=min_steps, row_align=row_align)
    assert B % block_b == 0
    rows = block_b * N

    # ---- fold the LayerNorm affine into the projection and reshape weights
    #      to per-head (head-major) form at wrapper time (one-off, free) -----
    lnw = params['ln_weight'].astype(f32)
    lnb = params['ln_bias'].astype(f32)
    w_in = params['w_in'].astype(f32)                       # (dim, inner)
    w_in_h = ((lnw[:, None] * w_in)
              .reshape(dim, heads, dim_head)
              .transpose(1, 0, 2)
              .astype(compute_dtype))                       # (heads, dim, d)
    b_in_h = (lnb @ w_in).reshape(heads, dim_head).astype(f32)
    w_out_h = (params['w_out'].astype(compute_dtype)
               .reshape(heads, dim_head, dim))              # (heads, d, dim)
    b_out = params['b_out'].reshape(1, dim).astype(f32)

    # Inputs are DMA'd at their original dtype so LayerNorm statistics see
    # un-rounded data; only matmul operands are cast in-kernel.
    q2 = q.reshape(B * N, dim)
    k2 = k.reshape(B * N, dim)
    v2 = v.reshape(B * N, dim)

    kernel = functools.partial(
        _attention_kernel, block_b=block_b, seq_len=N, heads=heads,
        dim_head=dim_head, scale=dim_head ** (-0.5), variant=variant,
        ln_eps=ln_eps, cosine_eps=cosine_eps, compute_dtype=compute_dtype,
        approx_recip=approx_recip)

    row_spec = pl.BlockSpec((rows, dim), lambda b: (b, 0))

    def full_spec(shape):
        zeros = (0,) * len(shape)
        return pl.BlockSpec(shape, lambda b: zeros)

    # Advisory cost estimate so XLA can overlap surrounding ops.
    proj_flops = 2 * 3 * B * N * dim * inner_dim
    attn_flops = 2 * 2 * B * heads * N * N * dim_head
    out_flops = 2 * B * N * inner_dim * dim
    ln_flops = 8 * 3 * B * N * dim
    if variant == 'cosine':
        transcendentals = 3 * B * N + 2 * B * heads * N
    else:
        transcendentals = 3 * B * N + B * heads * N * N
    bytes_accessed = (3 * B * N * dim * in_bytes + B * N * dim * 4
                      + 2 * dim * inner_dim * compute_bytes
                      + (inner_dim + dim) * 4)
    cost = pl.CostEstimate(
        flops=int(proj_flops + attn_flops + out_flops + ln_flops),
        transcendentals=int(transcendentals),
        bytes_accessed=int(bytes_accessed))

    out = pl.pallas_call(
        kernel,
        out_shape=jax.ShapeDtypeStruct((B * N, dim), f32),
        grid=(B // block_b,),
        in_specs=[row_spec, row_spec, row_spec,
                  full_spec((heads, dim, dim_head)),
                  full_spec((heads, dim_head)),
                  full_spec((heads, dim_head, dim)),
                  full_spec((1, dim))],
        out_specs=pl.BlockSpec((rows, dim), lambda b: (b, 0)),
        compiler_params=pltpu.CompilerParams(
            dimension_semantics=("parallel",),
            vmem_limit_bytes=vmem_limit),
        cost_estimate=cost,
    )(q2, k2, v2, w_in_h, b_in_h, w_out_h, b_out)
    return out.reshape(B, N, dim)


def attention_reference(q, k, v, params, *, heads, dim_head, variant='cosine',
                        eps=1e-5):
    """Pure-JAX reference mirroring the PyTorch forward, for validation."""
    B, N, dim = q.shape
    d = dim_head

    def input_linear(x):
        mu = jnp.mean(x, axis=-1, keepdims=True)
        var = jnp.mean(jnp.square(x - mu), axis=-1, keepdims=True)
        xn = (x - mu) / jnp.sqrt(var + eps)
        xn = xn * params['ln_weight'] + params['ln_bias']
        return xn @ params['w_in']                              # (B, N, inner)

    def split_heads(t):  # 'q n (h d) -> h q n d'
        return jnp.transpose(t.reshape(B, N, heads, d), (2, 0, 1, 3))

    f_q, f_k, f_v = (split_heads(input_linear(t)) for t in (q, k, v))
    dots = jnp.einsum('hbnd,hbmd->hbnm', f_q, f_k)
    if variant == 'cosine':
        qn = jnp.linalg.norm(f_q, axis=-1)                      # (h, B, N)
        kn = jnp.linalg.norm(f_k, axis=-1)
        attn = dots / (qn[..., :, None] * kn[..., None, :])
    else:
        attn = jax.nn.softmax(dots * d ** (-0.5), axis=-1)
    out = jnp.einsum('hbnm,hbmd->hbnd', attn, f_v)
    out = jnp.transpose(out, (1, 2, 0, 3)).reshape(B, N, heads * d)
    return out @ params['w_out'] + params['b_out']


if __name__ == "__main__":
    # Small shapes consistent with the module's forward.
    B, N, dim = 2, 8, 32
    heads, dim_head = 4, 8
    inner_dim = heads * dim_head

    key = jax.random.PRNGKey(0)
    kq, kk, kv, k1, k2, k3, k4, k5 = jax.random.split(key, 8)

    q = jax.random.normal(kq, (B, N, dim), dtype=jnp.float32)
    k = jax.random.normal(kk, (B, N, dim), dtype=jnp.float32)
    v = jax.random.normal(kv, (B, N, dim), dtype=jnp.float32)

    params = {
        # non-trivial affine so the wrapper-side LayerNorm fold is exercised
        'ln_weight': 1.0 + 0.1 * jax.random.normal(k4, (dim,), dtype=jnp.float32),
        'ln_bias': 0.1 * jax.random.normal(k5, (dim,), dtype=jnp.float32),
        # stored as (in_features, out_features) so the kernel computes x @ W
        'w_in': 0.1 * jax.random.normal(k1, (dim, inner_dim), dtype=jnp.float32),
        'w_out': 0.1 * jax.random.normal(k2, (inner_dim, dim), dtype=jnp.float32),
        'b_out': 0.01 * jax.random.normal(k3, (dim,), dtype=jnp.float32),
    }

    ref_cos = attention_reference(q, k, v, params, heads=heads,
                                  dim_head=dim_head, variant='cosine')
    ref_sm = attention_reference(q, k, v, params, heads=heads,
                                 dim_head=dim_head, variant='softmax')

    # 1) cosine variant, explicit f32 compute path (tight parity).
    out = jax.block_until_ready(attention_forward(
        q, k, v, params, heads=heads, dim_head=dim_head, variant='cosine',
        compute_dtype=jnp.float32))
    assert out.shape == (B, N, dim)
    assert jnp.allclose(out, ref_cos, atol=1e-4, rtol=1e-4), (
        float(jnp.max(jnp.abs(out - ref_cos))))

    # 2) softmax variant, explicit f32 compute path.
    out_sm = jax.block_until_ready(attention_forward(
        q, k, v, params, heads=heads, dim_head=dim_head, variant='softmax',
        compute_dtype=jnp.float32))
    assert jnp.allclose(out_sm, ref_sm, atol=1e-4, rtol=1e-4), (
        float(jnp.max(jnp.abs(out_sm - ref_sm))))

    # 3) explicit bf16 MXU-operand path -- loose tolerance since matmul
    #    operands are rounded to bf16 (stats/accumulation stay f32).
    out_bf = jax.block_until_ready(attention_forward(
        q, k, v, params, heads=heads, dim_head=dim_head, variant='cosine',
        compute_dtype=jnp.bfloat16))
    assert jnp.allclose(out_bf, ref_cos, atol=1e-1, rtol=5e-2), (
        float(jnp.max(jnp.abs(out_bf - ref_cos))))

    # 4) device-default compute path (bf16 on v6e/v7x, f32 elsewhere).
    out_auto = jax.block_until_ready(attention_forward(
        q, k, v, params, heads=heads, dim_head=dim_head, variant='cosine'))
    assert jnp.allclose(out_auto, ref_cos, atol=1e-1, rtol=5e-2), (
        float(jnp.max(jnp.abs(out_auto - ref_cos))))

    print("KERNEL_OK")
</pallas_src>

<mosaic_0001>
module attributes {stable_mosaic.version = 11 : i64} {
  func.func @_attention_kernel(%arg0: i32, %arg1: memref<16x32xf32, #tpu.memory_space<vmem>>, %arg2: memref<16x32xf32, #tpu.memory_space<vmem>>, %arg3: memref<16x32xf32, #tpu.memory_space<vmem>>, %arg4: memref<4x32x8xf32, #tpu.memory_space<vmem>>, %arg5: memref<4x8xf32, #tpu.memory_space<vmem>>, %arg6: memref<4x8x32xf32, #tpu.memory_space<vmem>>, %arg7: memref<1x32xf32, #tpu.memory_space<vmem>>, %arg8: memref<16x32xf32, #tpu.memory_space<vmem>>) attributes {dimension_semantics = [#tpu.dimension_semantics<parallel>], iteration_bounds = array<i64: 1>, scalar_prefetch = 0 : i64, scratch_operands = 0 : i64, tpu.core_type = #tpu.core_type<tc>, window_params = [{transform_indices = @transform_0, window_bounds = array<i64: 16, 32>}, {transform_indices = @transform_1, window_bounds = array<i64: 16, 32>}, {transform_indices = @transform_2, window_bounds = array<i64: 16, 32>}, {pipeline_mode = #tpu.pipeline_mode<synchronous>, transform_indices = @transform_3, window_bounds = array<i64: 4, 32, 8>}, {pipeline_mode = #tpu.pipeline_mode<synchronous>, transform_indices = @transform_4, window_bounds = array<i64: 4, 8>}, {pipeline_mode = #tpu.pipeline_mode<synchronous>, transform_indices = @transform_5, window_bounds = array<i64: 4, 8, 32>}, {pipeline_mode = #tpu.pipeline_mode<synchronous>, transform_indices = @transform_6, window_bounds = array<i64: 1, 32>}, {transform_indices = @transform_7, window_bounds = array<i64: 16, 32>}]} {
    %c0 = arith.constant 0 : index
    %c0_0 = arith.constant 0 : index
    %c0_1 = arith.constant 0 : index
    %0 = vector.load %arg4[%c0, %c0_0, %c0_1] : memref<4x32x8xf32, #tpu.memory_space<vmem>>, vector<4x32x8xf32>
    %c0_2 = arith.constant 0 : index
    %c0_3 = arith.constant 0 : index
    %1 = vector.load %arg5[%c0_2, %c0_3] : memref<4x8xf32, #tpu.memory_space<vmem>>, vector<4x8xf32>
    %c0_4 = arith.constant 0 : index
    %c0_5 = arith.constant 0 : index
    %c0_6 = arith.constant 0 : index
    %2 = vector.load %arg6[%c0_4, %c0_5, %c0_6] : memref<4x8x32xf32, #tpu.memory_space<vmem>>, vector<4x8x32xf32>
    %c0_7 = arith.constant 0 : index
    %c0_8 = arith.constant 0 : index
    %3 = vector.load %arg7[%c0_7, %c0_8] : memref<1x32xf32, #tpu.memory_space<vmem>>, vector<1x32xf32>
    %c0_9 = arith.constant 0 : index
    %c0_10 = arith.constant 0 : index
    %4 = vector.load %arg1[%c0_9, %c0_10] : memref<16x32xf32, #tpu.memory_space<vmem>>, vector<16x32xf32>
    %cst = arith.constant dense<0.000000e+00> : vector<16xf32>
    %5 = vector.multi_reduction <add>, %4, %cst [1] : vector<16x32xf32> to vector<16xf32>
    %6 = vector.shape_cast %5 : vector<16xf32> to vector<16x1xf32>
    %cst_11 = arith.constant 3.200000e+01 : f32
    %7 = vector.broadcast %cst_11 : f32 to vector<16x1xf32>
    %8 = arith.divf %6, %7 : vector<16x1xf32>
    %9 = vector.broadcast %8 : vector<16x1xf32> to vector<16x32xf32>
    %10 = arith.subf %4, %9 : vector<16x32xf32>
    %11 = arith.mulf %10, %10 : vector<16x32xf32>
    %cst_12 = arith.constant dense<0.000000e+00> : vector<16xf32>
    %12 = vector.multi_reduction <add>, %11, %cst_12 [1] : vector<16x32xf32> to vector<16xf32>
    %13 = vector.shape_cast %12 : vector<16xf32> to vector<16x1xf32>
    %cst_13 = arith.constant 3.200000e+01 : f32
    %14 = vector.broadcast %cst_13 : f32 to vector<16x1xf32>
    %15 = arith.divf %13, %14 : vector<16x1xf32>
    %16 = vector.broadcast %8 : vector<16x1xf32> to vector<16x32xf32>
    %17 = arith.subf %4, %16 : vector<16x32xf32>
    %cst_14 = arith.constant 9.99999974E-6 : f32
    %18 = vector.broadcast %cst_14 : f32 to vector<16x1xf32>
    %19 = arith.addf %15, %18 : vector<16x1xf32>
    %20 = math.rsqrt %19 : vector<16x1xf32>
    %21 = vector.broadcast %20 : vector<16x1xf32> to vector<16x32xf32>
    %22 = arith.mulf %17, %21 : vector<16x32xf32>
    %23 = vector.extract_strided_slice %0 {offsets = [0, 0, 0], sizes = [1, 32, 8], strides = [1, 1, 1]} : vector<4x32x8xf32> to vector<1x32x8xf32>
    %24 = vector.shape_cast %23 : vector<1x32x8xf32> to vector<32x8xf32>
    %cst_15 = arith.constant dense<0.000000e+00> : vector<16x8xf32>
    %25 = tpu.matmul %22, %24, %cst_15 {dimension_numbers = #tpu.dot_dimension_numbers<[1], [0], [0], [1], [0, 0, 1, 1], [], []>} : vector<16x32xf32>, vector<32x8xf32>, vector<16x8xf32> -> vector<16x8xf32>
    %26 = vector.extract_strided_slice %1 {offsets = [0, 0], sizes = [1, 8], strides = [1, 1]} : vector<4x8xf32> to vector<1x8xf32>
    %27 = vector.shape_cast %26 : vector<1x8xf32> to vector<8xf32>
    %28 = vector.shape_cast %27 : vector<8xf32> to vector<1x8xf32>
    %29 = vector.broadcast %28 : vector<1x8xf32> to vector<16x8xf32>
    %30 = arith.addf %25, %29 : vector<16x8xf32>
    %31 = vector.extract_strided_slice %0 {offsets = [1, 0, 0], sizes = [1, 32, 8], strides = [1, 1, 1]} : vector<4x32x8xf32> to vector<1x32x8xf32>
    %32 = vector.shape_cast %31 : vector<1x32x8xf32> to vector<32x8xf32>
    %cst_16 = arith.constant dense<0.000000e+00> : vector<16x8xf32>
    %33 = tpu.matmul %22, %32, %cst_16 {dimension_numbers = #tpu.dot_dimension_numbers<[1], [0], [0], [1], [0, 0, 1, 1], [], []>} : vector<16x32xf32>, vector<32x8xf32>, vector<16x8xf32> -> vector<16x8xf32>
    %34 = vector.extract_strided_slice %1 {offsets = [1, 0], sizes = [1, 8], strides = [1, 1]} : vector<4x8xf32> to vector<1x8xf32>
    %35 = vector.shape_cast %34 : vector<1x8xf32> to vector<8xf32>
    %36 = vector.shape_cast %35 : vector<8xf32> to vector<1x8xf32>
    %37 = vector.broadcast %36 : vector<1x8xf32> to vector<16x8xf32>
    %38 = arith.addf %33, %37 : vector<16x8xf32>
    %39 = vector.extract_strided_slice %0 {offsets = [2, 0, 0], sizes = [1, 32, 8], strides = [1, 1, 1]} : vector<4x32x8xf32> to vector<1x32x8xf32>
    %40 = vector.shape_cast %39 : vector<1x32x8xf32> to vector<32x8xf32>
    %cst_17 = arith.constant dense<0.000000e+00> : vector<16x8xf32>
    %41 = tpu.matmul %22, %40, %cst_17 {dimension_numbers = #tpu.dot_dimension_numbers<[1], [0], [0], [1], [0, 0, 1, 1], [], []>} : vector<16x32xf32>, vector<32x8xf32>, vector<16x8xf32> -> vector<16x8xf32>
    %42 = vector.extract_strided_slice %1 {offsets = [2, 0], sizes = [1, 8], strides = [1, 1]} : vector<4x8xf32> to vector<1x8xf32>
    %43 = vector.shape_cast %42 : vector<1x8xf32> to vector<8xf32>
    %44 = vector.shape_cast %43 : vector<8xf32> to vector<1x8xf32>
    %45 = vector.broadcast %44 : vector<1x8xf32> to vector<16x8xf32>
    %46 = arith.addf %41, %45 : vector<16x8xf32>
    %47 = vector.extract_strided_slice %0 {offsets = [3, 0, 0], sizes = [1, 32, 8], strides = [1, 1, 1]} : vector<4x32x8xf32> to vector<1x32x8xf32>
    %48 = vector.shape_cast %47 : vector<1x32x8xf32> to vector<32x8xf32>
    %cst_18 = arith.constant dense<0.000000e+00> : vector<16x8xf32>
    %49 = tpu.matmul %22, %48, %cst_18 {dimension_numbers = #tpu.dot_dimension_numbers<[1], [0], [0], [1], [0, 0, 1, 1], [], []>} : vector<16x32xf32>, vector<32x8xf32>, vector<16x8xf32> -> vector<16x8xf32>
    %50 = vector.extract_strided_slice %1 {offsets = [3, 0], sizes = [1, 8], strides = [1, 1]} : vector<4x8xf32> to vector<1x8xf32>
    %51 = vector.shape_cast %50 : vector<1x8xf32> to vector<8xf32>
    %52 = vector.shape_cast %51 : vector<8xf32> to vector<1x8xf32>
    %53 = vector.broadcast %52 : vector<1x8xf32> to vector<16x8xf32>
    %54 = arith.addf %49, %53 : vector<16x8xf32>
    %55 = tpu.concatenate %30, %38, %46, %54 in 0 : vector<16x8xf32>, vector<16x8xf32>, vector<16x8xf32>, vector<16x8xf32> -> vector<64x8xf32>
    %56 = vector.shape_cast %55 : vector<64x8xf32> to vector<8x8x8xf32>
    %c0_19 = arith.constant 0 : index
    %c0_20 = arith.constant 0 : index
    %57 = vector.load %arg2[%c0_19, %c0_20] : memref<16x32xf32, #tpu.memory_space<vmem>>, vector<16x32xf32>
    %cst_21 = arith.constant dense<0.000000e+00> : vector<16xf32>
    %58 = vector.multi_reduction <add>, %57, %cst_21 [1] : vector<16x32xf32> to vector<16xf32>
    %59 = vector.shape_cast %58 : vector<16xf32> to vector<16x1xf32>
    %cst_22 = arith.constant 3.200000e+01 : f32
    %60 = vector.broadcast %cst_22 : f32 to vector<16x1xf32>
    %61 = arith.divf %59, %60 : vector<16x1xf32>
    %62 = vector.broadcast %61 : vector<16x1xf32> to vector<16x32xf32>
    %63 = arith.subf %57, %62 : vector<16x32xf32>
    %64 = arith.mulf %63, %63 : vector<16x32xf32>
    %cst_23 = arith.constant dense<0.000000e+00> : vector<16xf32>
    %65 = vector.multi_reduction <add>, %64, %cst_23 [1] : vector<16x32xf32> to vector<16xf32>
    %66 = vector.shape_cast %65 : vector<16xf32> to vector<16x1xf32>
    %cst_24 = arith.constant 3.200000e+01 : f32
    %67 = vector.broadcast %cst_24 : f32 to vector<16x1xf32>
    %68 = arith.divf %66, %67 : vector<16x1xf32>
    %69 = vector.broadcast %61 : vector<16x1xf32> to vector<16x32xf32>
    %70 = arith.subf %57, %69 : vector<16x32xf32>
    %cst_25 = arith.constant 9.99999974E-6 : f32
    %71 = vector.broadcast %cst_25 : f32 to vector<16x1xf32>
    %72 = arith.addf %68, %71 : vector<16x1xf32>
    %73 = math.rsqrt %72 : vector<16x1xf32>
    %74 = vector.broadcast %73 : vector<16x1xf32> to vector<16x32xf32>
    %75 = arith.mulf %70, %74 : vector<16x32xf32>
    %76 = vector.extract_strided_slice %0 {offsets = [0, 0, 0], sizes = [1, 32, 8], strides = [1, 1, 1]} : vector<4x32x8xf32> to vector<1x32x8xf32>
    %77 = vector.shape_cast %76 : vector<1x32x8xf32> to vector<32x8xf32>
    %cst_26 = arith.constant dense<0.000000e+00> : vector<16x8xf32>
    %78 = tpu.matmul %75, %77, %cst_26 {dimension_numbers = #tpu.dot_dimension_numbers<[1], [0], [0], [1], [0, 0, 1, 1], [], []>} : vector<16x32xf32>, vector<32x8xf32>, vector<16x8xf32> -> vector<16x8xf32>
    %79 = vector.extract_strided_slice %1 {offsets = [0, 0], sizes = [1, 8], strides = [1, 1]} : vector<4x8xf32> to vector<1x8xf32>
    %80 = vector.shape_cast %79 : vector<1x8xf32> to vector<8xf32>
    %81 = vector.shape_cast %80 : vector<8xf32> to vector<1x8xf32>
    %82 = vector.broadcast %81 : vector<1x8xf32> to vector<16x8xf32>
    %83 = arith.addf %78, %82 : vector<16x8xf32>
    %84 = vector.extract_strided_slice %0 {offsets = [1, 0, 0], sizes = [1, 32, 8], strides = [1, 1, 1]} : vector<4x32x8xf32> to vector<1x32x8xf32>
    %85 = vector.shape_cast %84 : vector<1x32x8xf32> to vector<32x8xf32>
    %cst_27 = arith.constant dense<0.000000e+00> : vector<16x8xf32>
    %86 = tpu.matmul %75, %85, %cst_27 {dimension_numbers = #tpu.dot_dimension_numbers<[1], [0], [0], [1], [0, 0, 1, 1], [], []>} : vector<16x32xf32>, vector<32x8xf32>, vector<16x8xf32> -> vector<16x8xf32>
    %87 = vector.extract_strided_slice %1 {offsets = [1, 0], sizes = [1, 8], strides = [1, 1]} : vector<4x8xf32> to vector<1x8xf32>
    %88 = vector.shape_cast %87 : vector<1x8xf32> to vector<8xf32>
    %89 = vector.shape_cast %88 : vector<8xf32> to vector<1x8xf32>
    %90 = vector.broadcast %89 : vector<1x8xf32> to vector<16x8xf32>
    %91 = arith.addf %86, %90 : vector<16x8xf32>
    %92 = vector.extract_strided_slice %0 {offsets = [2, 0, 0], sizes = [1, 32, 8], strides = [1, 1, 1]} : vector<4x32x8xf32> to vector<1x32x8xf32>
    %93 = vector.shape_cast %92 : vector<1x32x8xf32> to vector<32x8xf32>
    %cst_28 = arith.constant dense<0.000000e+00> : vector<16x8xf32>
    %94 = tpu.matmul %75, %93, %cst_28 {dimension_numbers = #tpu.dot_dimension_numbers<[1], [0], [0], [1], [0, 0, 1, 1], [], []>} : vector<16x32xf32>, vector<32x8xf32>, vector<16x8xf32> -> vector<16x8xf32>
    %95 = vector.extract_strided_slice %1 {offsets = [2, 0], sizes = [1, 8], strides = [1, 1]} : vector<4x8xf32> to vector<1x8xf32>
    %96 = vector.shape_cast %95 : vector<1x8xf32> to vector<8xf32>
    %97 = vector.shape_cast %96 : vector<8xf32> to vector<1x8xf32>
    %98 = vector.broadcast %97 : vector<1x8xf32> to vector<16x8xf32>
    %99 = arith.addf %94, %98 : vector<16x8xf32>
    %100 = vector.extract_strided_slice %0 {offsets = [3, 0, 0], sizes = [1, 32, 8], strides = [1, 1, 1]} : vector<4x32x8xf32> to vector<1x32x8xf32>
    %101 = vector.shape_cast %100 : vector<1x32x8xf32> to vector<32x8xf32>
    %cst_29 = arith.constant dense<0.000000e+00> : vector<16x8xf32>
    %102 = tpu.matmul %75, %101, %cst_29 {dimension_numbers = #tpu.dot_dimension_numbers<[1], [0], [0], [1], [0, 0, 1, 1], [], []>} : vector<16x32xf32>, vector<32x8xf32>, vector<16x8xf32> -> vector<16x8xf32>
    %103 = vector.extract_strided_slice %1 {offsets = [3, 0], sizes = [1, 8], strides = [1, 1]} : vector<4x8xf32> to vector<1x8xf32>
    %104 = vector.shape_cast %103 : vector<1x8xf32> to vector<8xf32>
    %105 = vector.shape_cast %104 : vector<8xf32> to vector<1x8xf32>
    %106 = vector.broadcast %105 : vector<1x8xf32> to vector<16x8xf32>
    %107 = arith.addf %102, %106 : vector<16x8xf32>
    %108 = tpu.concatenate %83, %91, %99, %107 in 0 : vector<16x8xf32>, vector<16x8xf32>, vector<16x8xf32>, vector<16x8xf32> -> vector<64x8xf32>
    %109 = vector.shape_cast %108 : vector<64x8xf32> to vector<8x8x8xf32>
    %c0_30 = arith.constant 0 : index
    %c0_31 = arith.constant 0 : index
    %110 = vector.load %arg3[%c0_30, %c0_31] : memref<16x32xf32, #tpu.memory_space<vmem>>, vector<16x32xf32>
    %cst_32 = arith.constant dense<0.000000e+00> : vector<16xf32>
    %111 = vector.multi_reduction <add>, %110, %cst_32 [1] : vector<16x32xf32> to vector<16xf32>
    %112 = vector.shape_cast %111 : vector<16xf32> to vector<16x1xf32>
    %cst_33 = arith.constant 3.200000e+01 : f32
    %113 = vector.broadcast %cst_33 : f32 to vector<16x1xf32>
    %114 = arith.divf %112, %113 : vector<16x1xf32>
    %115 = vector.broadcast %114 : vector<16x1xf32> to vector<16x32xf32>
    %116 = arith.subf %110, %115 : vector<16x32xf32>
    %117 = arith.mulf %116, %116 : vector<16x32xf32>
    %cst_34 = arith.constant dense<0.000000e+00> : vector<16xf32>
    %118 = vector.multi_reduction <add>, %117, %cst_34 [1] : vector<16x32xf32> to vector<16xf32>
    %119 = vector.shape_cast %118 : vector<16xf32> to vector<16x1xf32>
    %cst_35 = arith.constant 3.200000e+01 : f32
    %120 = vector.broadcast %cst_35 : f32 to vector<16x1xf32>
    %121 = arith.divf %119, %120 : vector<16x1xf32>
    %122 = vector.broadcast %114 : vector<16x1xf32> to vector<16x32xf32>
    %123 = arith.subf %110, %122 : vector<16x32xf32>
    %cst_36 = arith.constant 9.99999974E-6 : f32
    %124 = vector.broadcast %cst_36 : f32 to vector<16x1xf32>
    %125 = arith.addf %121, %124 : vector<16x1xf32>
    %126 = math.rsqrt %125 : vector<16x1xf32>
    %127 = vector.broadcast %126 : vector<16x1xf32> to vector<16x32xf32>
    %128 = arith.mulf %123, %127 : vector<16x32xf32>
    %129 = vector.extract_strided_slice %0 {offsets = [0, 0, 0], sizes = [1, 32, 8], strides = [1, 1, 1]} : vector<4x32x8xf32> to vector<1x32x8xf32>
    %130 = vector.shape_cast %129 : vector<1x32x8xf32> to vector<32x8xf32>
    %cst_37 = arith.constant dense<0.000000e+00> : vector<16x8xf32>
    %131 = tpu.matmul %128, %130, %cst_37 {dimension_numbers = #tpu.dot_dimension_numbers<[1], [0], [0], [1], [0, 0, 1, 1], [], []>} : vector<16x32xf32>, vector<32x8xf32>, vector<16x8xf32> -> vector<16x8xf32>
    %132 = vector.extract_strided_slice %1 {offsets = [0, 0], sizes = [1, 8], strides = [1, 1]} : vector<4x8xf32> to vector<1x8xf32>
    %133 = vector.shape_cast %132 : vector<1x8xf32> to vector<8xf32>
    %134 = vector.shape_cast %133 : vector<8xf32> to vector<1x8xf32>
    %135 = vector.broadcast %134 : vector<1x8xf32> to vector<16x8xf32>
    %136 = arith.addf %131, %135 : vector<16x8xf32>
    %137 = vector.extract_strided_slice %0 {offsets = [1, 0, 0], sizes = [1, 32, 8], strides = [1, 1, 1]} : vector<4x32x8xf32> to vector<1x32x8xf32>
    %138 = vector.shape_cast %137 : vector<1x32x8xf32> to vector<32x8xf32>
    %cst_38 = arith.constant dense<0.000000e+00> : vector<16x8xf32>
    %139 = tpu.matmul %128, %138, %cst_38 {dimension_numbers = #tpu.dot_dimension_numbers<[1], [0], [0], [1], [0, 0, 1, 1], [], []>} : vector<16x32xf32>, vector<32x8xf32>, vector<16x8xf32> -> vector<16x8xf32>
    %140 = vector.extract_strided_slice %1 {offsets = [1, 0], sizes = [1, 8], strides = [1, 1]} : vector<4x8xf32> to vector<1x8xf32>
    %141 = vector.shape_cast %140 : vector<1x8xf32> to vector<8xf32>
    %142 = vector.shape_cast %141 : vector<8xf32> to vector<1x8xf32>
    %143 = vector.broadcast %142 : vector<1x8xf32> to vector<16x8xf32>
    %144 = arith.addf %139, %143 : vector<16x8xf32>
    %145 = vector.extract_strided_slice %0 {offsets = [2, 0, 0], sizes = [1, 32, 8], strides = [1, 1, 1]} : vector<4x32x8xf32> to vector<1x32x8xf32>
    %146 = vector.shape_cast %145 : vector<1x32x8xf32> to vector<32x8xf32>
    %cst_39 = arith.constant dense<0.000000e+00> : vector<16x8xf32>
    %147 = tpu.matmul %128, %146, %cst_39 {dimension_numbers = #tpu.dot_dimension_numbers<[1], [0], [0], [1], [0, 0, 1, 1], [], []>} : vector<16x32xf32>, vector<32x8xf32>, vector<16x8xf32> -> vector<16x8xf32>
    %148 = vector.extract_strided_slice %1 {offsets = [2, 0], sizes = [1, 8], strides = [1, 1]} : vector<4x8xf32> to vector<1x8xf32>
    %149 = vector.shape_cast %148 : vector<1x8xf32> to vector<8xf32>
    %150 = vector.shape_cast %149 : vector<8xf32> to vector<1x8xf32>
    %151 = vector.broadcast %150 : vector<1x8xf32> to vector<16x8xf32>
    %152 = arith.addf %147, %151 : vector<16x8xf32>
    %153 = vector.extract_strided_slice %0 {offsets = [3, 0, 0], sizes = [1, 32, 8], strides = [1, 1, 1]} : vector<4x32x8xf32> to vector<1x32x8xf32>
    %154 = vector.shape_cast %153 : vector<1x32x8xf32> to vector<32x8xf32>
    %cst_40 = arith.constant dense<0.000000e+00> : vector<16x8xf32>
    %155 = tpu.matmul %128, %154, %cst_40 {dimension_numbers = #tpu.dot_dimension_numbers<[1], [0], [0], [1], [0, 0, 1, 1], [], []>} : vector<16x32xf32>, vector<32x8xf32>, vector<16x8xf32> -> vector<16x8xf32>
    %156 = vector.extract_strided_slice %1 {offsets = [3, 0], sizes = [1, 8], strides = [1, 1]} : vector<4x8xf32> to vector<1x8xf32>
    %157 = vector.shape_cast %156 : vector<1x8xf32> to vector<8xf32>
    %158 = vector.shape_cast %157 : vector<8xf32> to vector<1x8xf32>
    %159 = vector.broadcast %158 : vector<1x8xf32> to vector<16x8xf32>
    %160 = arith.addf %155, %159 : vector<16x8xf32>
    %161 = tpu.concatenate %136, %144, %152, %160 in 0 : vector<16x8xf32>, vector<16x8xf32>, vector<16x8xf32>, vector<16x8xf32> -> vector<64x8xf32>
    %162 = vector.shape_cast %161 : vector<64x8xf32> to vector<8x8x8xf32>
    %163 = arith.mulf %56, %56 : vector<8x8x8xf32>
    %cst_41 = arith.constant dense<0.000000e+00> : vector<8x8xf32>
    %164 = vector.multi_reduction <add>, %163, %cst_41 [2] : vector<8x8x8xf32> to vector<8x8xf32>
    %165 = vector.shape_cast %164 : vector<8x8xf32> to vector<8x8x1xf32>
    %cst_42 = arith.constant 9.99999996E-13 : f32
    %166 = vector.broadcast %cst_42 : f32 to vector<8x8x1xf32>
    %167 = arith.addf %165, %166 : vector<8x8x1xf32>
    %168 = math.rsqrt %167 : vector<8x8x1xf32>
    %169 = vector.broadcast %168 : vector<8x8x1xf32> to vector<8x8x8xf32>
    %170 = arith.mulf %56, %169 : vector<8x8x8xf32>
    %171 = arith.mulf %109, %109 : vector<8x8x8xf32>
    %cst_43 = arith.constant dense<0.000000e+00> : vector<8x8xf32>
    %172 = vector.multi_reduction <add>, %171, %cst_43 [2] : vector<8x8x8xf32> to vector<8x8xf32>
    %173 = vector.shape_cast %172 : vector<8x8xf32> to vector<8x8x1xf32>
    %cst_44 = arith.constant 9.99999996E-13 : f32
    %174 = vector.broadcast %cst_44 : f32 to vector<8x8x1xf32>
    %175 = arith.addf %173, %174 : vector<8x8x1xf32>
    %176 = math.rsqrt %175 : vector<8x8x1xf32>
    %177 = vector.broadcast %176 : vector<8x8x1xf32> to vector<8x8x8xf32>
    %178 = arith.mulf %109, %177 : vector<8x8x8xf32>
    "tpu.trace_start"() <{level = 10 : i32, message = "bnd,bmd->bnm"}> : () -> ()
    %cst_45 = arith.constant dense<0.000000e+00> : vector<8x8x8xf32>
    %179 = tpu.matmul %170, %178, %cst_45 {dimension_numbers = #tpu.dot_dimension_numbers<[2], [2], [1], [1], [0, 0, 0, 1, 1, 1], [0], [0]>} : vector<8x8x8xf32>, vector<8x8x8xf32>, vector<8x8x8xf32> -> vector<8x8x8xf32>
    "tpu.trace_stop"() : () -> ()
    "tpu.trace_start"() <{level = 10 : i32, message = "bnm,bmd->bnd"}> : () -> ()
    %cst_46 = arith.constant dense<0.000000e+00> : vector<8x8x8xf32>
    %180 = tpu.matmul %179, %162, %cst_46 {dimension_numbers = #tpu.dot_dimension_numbers<[2], [1], [1], [2], [0, 0, 0, 1, 1, 2], [0], [0]>} : vector<8x8x8xf32>, vector<8x8x8xf32>, vector<8x8x8xf32> -> vector<8x8x8xf32>
    "tpu.trace_stop"() : () -> ()
    %181 = vector.extract_strided_slice %180 {offsets = [0, 0, 0], sizes = [2, 8, 8], strides = [1, 1, 1]} : vector<8x8x8xf32> to vector<2x8x8xf32>
    %182 = vector.shape_cast %181 : vector<2x8x8xf32> to vector<16x8xf32>
    %183 = vector.extract_strided_slice %2 {offsets = [0, 0, 0], sizes = [1, 8, 32], strides = [1, 1, 1]} : vector<4x8x32xf32> to vector<1x8x32xf32>
    %184 = vector.shape_cast %183 : vector<1x8x32xf32> to vector<8x32xf32>
    %cst_47 = arith.constant dense<0.000000e+00> : vector<16x32xf32>
    %185 = tpu.matmul %182, %184, %cst_47 {dimension_numbers = #tpu.dot_dimension_numbers<[1], [0], [0], [1], [0, 0, 1, 1], [], []>} : vector<16x8xf32>, vector<8x32xf32>, vector<16x32xf32> -> vector<16x32xf32>
    %186 = vector.extract_strided_slice %180 {offsets = [2, 0, 0], sizes = [2, 8, 8], strides = [1, 1, 1]} : vector<8x8x8xf32> to vector<2x8x8xf32>
    %187 = vector.shape_cast %186 : vector<2x8x8xf32> to vector<16x8xf32>
    %188 = vector.extract_strided_slice %2 {offsets = [1, 0, 0], sizes = [1, 8, 32], strides = [1, 1, 1]} : vector<4x8x32xf32> to vector<1x8x32xf32>
    %189 = vector.shape_cast %188 : vector<1x8x32xf32> to vector<8x32xf32>
    %cst_48 = arith.constant dense<0.000000e+00> : vector<16x32xf32>
    %190 = tpu.matmul %187, %189, %cst_48 {dimension_numbers = #tpu.dot_dimension_numbers<[1], [0], [0], [1], [0, 0, 1, 1], [], []>} : vector<16x8xf32>, vector<8x32xf32>, vector<16x32xf32> -> vector<16x32xf32>
    %191 = arith.addf %185, %190 : vector<16x32xf32>
    %192 = vector.extract_strided_slice %180 {offsets = [4, 0, 0], sizes = [2, 8, 8], strides = [1, 1, 1]} : vector<8x8x8xf32> to vector<2x8x8xf32>
    %193 = vector.shape_cast %192 : vector<2x8x8xf32> to vector<16x8xf32>
    %194 = vector.extract_strided_slice %2 {offsets = [2, 0, 0], sizes = [1, 8, 32], strides = [1, 1, 1]} : vector<4x8x32xf32> to vector<1x8x32xf32>
    %195 = vector.shape_cast %194 : vector<1x8x32xf32> to vector<8x32xf32>
    %cst_49 = arith.constant dense<0.000000e+00> : vector<16x32xf32>
    %196 = tpu.matmul %193, %195, %cst_49 {dimension_numbers = #tpu.dot_dimension_numbers<[1], [0], [0], [1], [0, 0, 1, 1], [], []>} : vector<16x8xf32>, vector<8x32xf32>, vector<16x32xf32> -> vector<16x32xf32>
    %197 = arith.addf %191, %196 : vector<16x32xf32>
    %198 = vector.extract_strided_slice %180 {offsets = [6, 0, 0], sizes = [2, 8, 8], strides = [1, 1, 1]} : vector<8x8x8xf32> to vector<2x8x8xf32>
    %199 = vector.shape_cast %198 : vector<2x8x8xf32> to vector<16x8xf32>
    %200 = vector.extract_strided_slice %2 {offsets = [3, 0, 0], sizes = [1, 8, 32], strides = [1, 1, 1]} : vector<4x8x32xf32> to vector<1x8x32xf32>
    %201 = vector.shape_cast %200 : vector<1x8x32xf32> to vector<8x32xf32>
    %cst_50 = arith.constant dense<0.000000e+00> : vector<16x32xf32>
    %202 = tpu.matmul %199, %201, %cst_50 {dimension_numbers = #tpu.dot_dimension_numbers<[1], [0], [0], [1], [0, 0, 1, 1], [], []>} : vector<16x8xf32>, vector<8x32xf32>, vector<16x32xf32> -> vector<16x32xf32>
    %203 = arith.addf %197, %202 : vector<16x32xf32>
    %204 = vector.broadcast %3 : vector<1x32xf32> to vector<16x32xf32>
    %205 = arith.addf %203, %204 : vector<16x32xf32>
    %c0_51 = arith.constant 0 : index
    %c0_52 = arith.constant 0 : index
    %206 = vector.load %arg8[%c0_51, %c0_52] : memref<16x32xf32, #tpu.memory_space<vmem>>, vector<16x32xf32>
    tpu.vector_store %arg8[%c0_51, %c0_52], %205 {strides = array<i32>} : memref<16x32xf32, #tpu.memory_space<vmem>>, vector<16x32xf32>,
    return
  }
  func.func @transform_0(%arg0: i32) -> (i32, i32) {
    %c0_i32 = arith.constant 0 : i32
    %c0_i32_0 = arith.constant 0 : i32
    return %arg0, %c0_i32 : i32, i32
  }
  func.func @transform_1(%arg0: i32) -> (i32, i32) {
    %c0_i32 = arith.constant 0 : i32
    %c0_i32_0 = arith.constant 0 : i32
    return %arg0, %c0_i32 : i32, i32
  }
  func.func @transform_2(%arg0: i32) -> (i32, i32) {
    %c0_i32 = arith.constant 0 : i32
    %c0_i32_0 = arith.constant 0 : i32
    return %arg0, %c0_i32 : i32, i32
  }
  func.func @transform_3(%arg0: i32) -> (i32, i32, i32) {
    %c0_i32 = arith.constant 0 : i32
    %c0_i32_0 = arith.constant 0 : i32
    %c0_i32_1 = arith.constant 0 : i32
    %c0_i32_2 = arith.constant 0 : i32
    return %c0_i32, %c0_i32_0, %c0_i32_1 : i32, i32, i32
  }
  func.func @transform_4(%arg0: i32) -> (i32, i32) {
    %c0_i32 = arith.constant 0 : i32
    %c0_i32_0 = arith.constant 0 : i32
    %c0_i32_1 = arith.constant 0 : i32
    return %c0_i32, %c0_i32_0 : i32, i32
  }
  func.func @transform_5(%arg0: i32) -> (i32, i32, i32) {
    %c0_i32 = arith.constant 0 : i32
    %c0_i32_0 = arith.constant 0 : i32
    %c0_i32_1 = arith.constant 0 : i32
    %c0_i32_2 = arith.constant 0 : i32
    return %c0_i32, %c0_i32_0, %c0_i32_1 : i32, i32, i32
  }
  func.func @transform_6(%arg0: i32) -> (i32, i32) {
    %c0_i32 = arith.constant 0 : i32
    %c0_i32_0 = arith.constant 0 : i32
    %c0_i32_1 = arith.constant 0 : i32
    return %c0_i32, %c0_i32_0 : i32, i32
  }
  func.func @transform_7(%arg0: i32) -> (i32, i32) {
    %c0_i32 = arith.constant 0 : i32
    %c0_i32_0 = arith.constant 0 : i32
    return %arg0, %c0_i32 : i32, i32
  }
}

</mosaic_0001>

<bundles_post_ra>
// kernel: tpu_custom_call.1
= control target key start
LH: loop header
LB: loop body
LE: loop exit
PB: predicated region body
PF: predicated region fallthrough
CT: control target
= control target key end

     0   :  { %vm51_vm0 = vcmask 261120   ;;  %s2152_s0 = inlined_call_operand.vmem [shape: f32[16,32], index: 0, kind: input, shape index: {}]   ;;  %s2153_s1 = inlined_call_operand.vmem [shape: f32[16,32], index: 1, kind: input, shape index: {}]   ;;  %s2154_s2 = inlined_call_operand.vmem [shape: f32[16,32], index: 2, kind: input, shape index: {}]   ;;  %s2155_s3 = inlined_call_operand.vmem [shape: f32[4,32,8], index: 3, kind: input, shape index: {}]   ;;  %s2156_s4 = inlined_call_operand.vmem [shape: f32[4,8], index: 4, kind: input, shape index: {}]   ;;  %s2157_s5 = inlined_call_operand.vmem [shape: f32[4,8,32], index: 5, kind: input, shape index: {}]   ;;  %s2158_s6 = inlined_call_operand.vmem [shape: f32[1,32], index: 6, kind: input, shape index: {}]   ;;  %s2159_s7 = inlined_call_operand.hbm [shape: f32[16,32], index: 7, kind: output, shape index: {}]  }
   0x1   :  { %v205_v0 = vld [vmem:[%s2153_s1] sm:$0xff] }
   0x2   :  { %v49_v1 = vld [vmem:[%s2152_s0] sm:$0xff]  ;;  %v207_v2 = vsel %vm51_vm0, %v205_v0, 0.0 }
   0x3   :  { %v52_v3 = vsel %vm51_vm0, %v49_v1, 0.0  ;;  %208 = vadd.xlane.f32.xlu1 %v207_v2 }
   0x4   :  { %53 = vadd.xlane.f32.xlu0 %v52_v3 }
   0x5   :  { %12 = vsyncpa [#allocation3], 0  ;;  %v206_v4 = vld [vmem:[%s2153_s1 + $0x8] sm:$0xff]  ;;  %v1420_v8 = vmov 32.0   ;;  %v1516_v37 = vld [vmem:[%s2154_s2] sm:$0xff]  ;;  %vm501_vm14 = vcmask 64512  }
   0x6   :  { %v50_v5 = vld [vmem:[%s2152_s0 + $0x8] sm:$0xff]  ;;  %v210_v6 = vsel %vm51_vm0, %v206_v4, 0.0  ;;  %1348 = vrcp.f32 %v1420_v8  ;;  %v351_v38 = vsel %vm51_vm0, %v1516_v37, 0.0  ;;  %v1523_v39 = vld [vmem:[%s2155_s3 + $0x18] sm:$0xff]  ;;  %v1547_v43 = vld [vmem:[%s2155_s3 + $0x10] sm:$0xff]  ;;  %s1421_s25 = smov [#allocation2]  }
   0x7   :  { %v55_v7 = vsel %vm51_vm0, %v50_v5, 0.0  ;;  %v1503_v31 = vld [vmem:[%s2154_s2 + $0x8] sm:$0xff]  ;;  %v1528_v40 = vld [vmem:[%s2155_s3 + $0x38] sm:$0xff]  ;;  %122 = vmatpush.msra.mxu0 %v1523_v39  ;;  %v1552_v44 = vld [vmem:[%s2155_s3 + $0x30] sm:$0xff]  ;;  %s1273_s26 = sshll.u32 %s1421_s25, 4  ;;  %s1275_s29 = sshll.u32 %s2159_s7, 4  ;;  %s1274_s26 = int_to_ptr.vmem [resolvable:$true] %s1273_s26  ;;  %s1276_s29 = int_to_ptr.hbm [resolvable:$true] %s1275_s29 }
   0x8   :  { %v354_v34 = vsel %vm51_vm0, %v1503_v31, 0.0  ;;  %v1533_v41 = vld [vmem:[%s2155_s3 + $0x58] sm:$0xff]  ;;  %146 = vmatpush.msra.mxu1 %v1528_v40  ;;  %v1557_v45 = vld [vmem:[%s2155_s3 + $0x50] sm:$0xff]  ;;  %v1571_v47 = vld [vmem:[%s2155_s3 + $0x8] sm:$0xff]  ;;  %s1423_s30 = smov 8  }
   0x9   :  { %v1540_v42 = vld [vmem:[%s2155_s3 + $0x78] sm:$0xff]  ;;  %170 = vmatpush.msra.mxu2 %v1533_v41  ;;  %123 = vmatpush.msra.mxu0 %v1547_v43  ;;  %v1564_v46 = vld [vmem:[%s2155_s3 + $0x70] sm:$0xff]  ;;  %v1576_v48 = vld [vmem:[%s2155_s3 + $0x28] sm:$0xff] }
   0xa   :  { %194 = vmatpush.msra.mxu3 %v1540_v42  ;;  %147 = vmatpush.msra.mxu1 %v1552_v44  ;;  %v1581_v49 = vld [vmem:[%s2155_s3 + $0x48] sm:$0xff]  ;;  %v1595_v51 = vld [vmem:[%s2155_s3] sm:$0xff] }
   0xb   :  { %211 = vadd.xlane.f32.xlu1 %v210_v6  ;;  %171 = vmatpush.msra.mxu2 %v1557_v45  ;;  %v1588_v50 = vld [vmem:[%s2155_s3 + $0x68] sm:$0xff]  ;;  %v1600_v52 = vld [vmem:[%s2155_s3 + $0x20] sm:$0xff] }
   0xc   :  { %56 = vadd.xlane.f32.xlu0 %v55_v7  ;;  %v1349_v9 = vpop.eup %1348  ;;  %195 = vmatpush.msra.mxu3 %v1564_v46  ;;  %v1605_v53 = vld [vmem:[%s2155_s3 + $0x40] sm:$0xff] }
   0xd   :  { %v59_v10 = vmul.f32 32.0, %v1349_v9  ;;  %vm63_vm1 = vweird.f32 %v1349_v9  ;;  %124 = vmatpush.msra.mxu0 %v1571_v47  ;;  %148 = vmatpush.msra.mxu1 %v1576_v48  ;;  %v1612_v54 = vld [vmem:[%s2155_s3 + $0x60] sm:$0xff] }
   0xe   :  { %172 = vmatpush.msra.mxu2 %v1581_v49  ;;  %196 = vmatpush.msra.mxu3 %v1588_v50 }
   0xf   :  { %v60_v11 = vsub.f32 1.0, %v59_v10  ;;  %125 = vmatpush.msra.mxu0 %v1595_v51  ;;  %149 = vmatpush.msra.mxu1 %v1600_v52 }
  0x10   :  { %173 = vmatpush.msra.mxu2 %v1605_v53  ;;  %197 = vmatpush.msra.mxu3 %v1612_v54 }
  0x11   :  { %v61_v12 = vmul.f32 %v1349_v9, %v60_v11  ;;  %292 = vmatpush.msrb.mxu1 %v1528_v40  ;;  %269 = vmatpush.msrb.mxu0 %v1523_v39 }
  0x12   :  { %315 = vmatpush.msrb.mxu2 %v1533_v41  ;;  %338 = vmatpush.msrb.mxu3 %v1540_v42 }
  0x13   :  { %v62_v13 = vadd.f32 %v1349_v9, %v61_v12  ;;  %270 = vmatpush.msrb.mxu0 %v1547_v43  ;;  %293 = vmatpush.msrb.mxu1 %v1552_v44 }
  0x14   :  { %316 = vmatpush.msrb.mxu2 %v1557_v45  ;;  %339 = vmatpush.msrb.mxu3 %v1564_v46 }
  0x15   :  { %v1480_v14 = vsel %vm63_vm1, %v1349_v9, %v62_v13  ;;  %271 = vmatpush.msrb.mxu0 %v1571_v47  ;;  %294 = vmatpush.msrb.mxu1 %v1576_v48 }
  0x16   :  { %317 = vmatpush.msrb.mxu2 %v1581_v49  ;;  %340 = vmatpush.msrb.mxu3 %v1588_v50 }
  0x17   :  { %272 = vmatpush.msrb.mxu0 %v1595_v51  ;;  %295 = vmatpush.msrb.mxu1 %v1600_v52 }
  0x18   :  { %318 = vmatpush.msrb.mxu2 %v1605_v53  ;;  %341 = vmatpush.msrb.mxu3 %v1612_v54 }
  0x76   :  { %v209_v15 = vpop.xlane.xlu1 %208 }
  0x77   :  { %v54_v16 = vpop.xlane.xlu0 %53  ;;  %v213_v17 = vmul.f32 %v209_v15, %v1480_v14 }
  0x78   :  { %v65_v18 = vmul.f32 %v1480_v14, %v54_v16 }
  0x79   :  { %v1484_v19 = vsub.f32 %v205_v0, %v213_v17 }
  0x7a   :  { %v1486_v20 = vsub.f32 %v49_v1, %v65_v18 }
  0x7b   :  { %v217_v21 = vmul.f32 %v1484_v19, %v1484_v19 }
  0x7c   :  { %v69_v22 = vmul.f32 %v1486_v20, %v1486_v20 }
  0x7d   :  { %v219_v23 = vsel %vm51_vm0, %v217_v21, 0.0 }
  0x7e   :  { %v71_v24 = vsel %vm51_vm0, %v69_v22, 0.0  ;;  %v212_v25 = vpop.xlane.xlu1 %211  ;;  %220 = vadd.xlane.f32.xlu0 %v219_v23 }
  0x7f   :  { %72 = vadd.xlane.f32.xlu2 %v71_v24  ;;  %v57_v26 = vpop.xlane.xlu0 %56  ;;  %v214_v27 = vmul.f32 %v212_v25, %v1480_v14 }
  0x80   :  { %v66_v28 = vmul.f32 %v1480_v14, %v57_v26 }
  0x81   :  { %v1496_v29 = vsub.f32 %v206_v4, %v214_v27 }
  0x82   :  { %v1498_v30 = vsub.f32 %v50_v5, %v66_v28 }
  0x83   :  { %v218_v32 = vmul.f32 %v1496_v29, %v1496_v29 }
  0x84   :  { %v70_v33 = vmul.f32 %v1498_v30, %v1498_v30 }
  0x85   :  { %v222_v35 = vsel %vm51_vm0, %v218_v32, 0.0 }
  0x86   :  { %v74_v36 = vsel %vm51_vm0, %v70_v33, 0.0  ;;  %223 = vadd.xlane.f32.xlu1 %v222_v35  ;;  %355 = vadd.xlane.f32.xlu0 %v354_v34 }
  0x87   :  { %75 = vadd.xlane.f32.xlu2 %v74_v36 }
  0x8f   :  { %352 = vadd.xlane.f32.xlu2 %v351_v38 }
  0xf1   :  { %v221_v56 = vpop.xlane.xlu0 %220 }
  0xf2   :  { %v73_v55 = vpop.xlane.xlu2 %72  ;;  %v225_v58 = vmul.f32 %v221_v56, %v1480_v14 }
  0xf3   :  { %v77_v57 = vmul.f32 %v73_v55, %v1480_v14 }
  0xf4   :  { %v1634_v60 = vadd.f32 1e-05, %v225_v58 }
  0xf5   :  { %v79_v59 = vadd.f32 1e-05, %v77_v57 }
  0xf6   :  { %vm235_vm8 = vweird.f32 %v1634_v60 }
  0xf7   :  { %1350 = vrsqrt.f32 %v79_v59  ;;  %vm87_vm3 = vweird.f32 %v79_v59 }
  0xf8   :  { %1352 = vrsqrt.f32 %v1634_v60 }
  0xf9   :  { %v224_v61 = vpop.xlane.xlu1 %223  ;;  %v356_v1 = vpop.xlane.xlu0 %355 }
  0xfa   :  { %v76_v62 = vpop.xlane.xlu2 %75  ;;  %v226_v63 = vmul.f32 %v224_v61, %v1480_v14  ;;  %v358_v2 = vmul.f32 %v356_v1, %v1480_v14 }
  0xfb   :  { %v78_v0 = vmul.f32 %v76_v62, %v1480_v14 }
  0xfc   :  { %v1640_v6 = vadd.f32 1e-05, %v226_v63  ;;  %v1643_v7 = vsub.f32 %v1503_v31, %v358_v2 }
  0xfd   :  { %v1351_v3 = vpop.eup %1350  ;;  %v80_v4 = vadd.f32 1e-05, %v78_v0 }
  0xfe   :  { %v82_v5 = vmul.f32 %v1351_v3, %v79_v59  ;;  %v1645_v8 = vpop.eup %1352  ;;  %v362_v10 = vmul.f32 %v1643_v7, %v1643_v7  ;;  %vm88_vm2 = vweird.f32 %v1351_v3  ;;  %vm245_vm11 = vweird.f32 %v1640_v6 }
  0xff   :  { %1354 = vrsqrt.f32 %v80_v4  ;;  %v230_v15 = vmul.f32 %v1645_v8, %v1634_v60  ;;  %vm89_vm4 = vmor %vm87_vm3, %vm88_vm2  ;;  %vm97_vm6 = vweird.f32 %v80_v4  ;;  %vm236_vm9 = vweird.f32 %v1645_v8 }
 0x100   :  { %v83_v9 = vmul.f32 %v1351_v3, %v82_v5  ;;  %1356 = vrsqrt.f32 %v1640_v6  ;;  %v366_v13 = vsel %vm51_vm0, %v362_v10, 0.0  ;;  %vm237_vm10 = vmor %vm235_vm8, %vm236_vm9 }
 0x101   :  { %367 = vadd.xlane.f32.xlu2 %v366_v13  ;;  %v231_v23 = vmul.f32 %v1645_v8, %v230_v15 }
 0x102   :  { %v84_v11 = vmul.f32 0.5, %v83_v9  ;;  %v353_v12 = vpop.xlane.xlu2 %352 }
 0x103   :  { %v357_v16 = vmul.f32 %v353_v12, %v1480_v14  ;;  %v232_v33 = vmul.f32 0.5, %v231_v23 }
 0x104   :  { %v85_v17 = vsub.f32 1.5, %v84_v11 }
 0x105   :  { %v1655_v18 = vsub.f32 %v1516_v37, %v357_v16  ;;  %v1355_v21 = vpop.eup %1354 }
 0x106   :  { %v86_v22 = vmul.f32 %v1351_v3, %v85_v17  ;;  %v92_v24 = vmul.f32 %v1355_v21, %v80_v4  ;;  %v1357_v26 = vpop.eup %1356  ;;  %vm98_vm5 = vweird.f32 %v1355_v21 }
 0x107   :  { %v361_v25 = vmul.f32 %v1655_v18, %v1655_v18  ;;  %v240_v34 = vmul.f32 %v1357_v26, %v1640_v6  ;;  %vm99_vm7 = vmor %vm97_vm6, %vm98_vm5  ;;  %vm246_vm12 = vweird.f32 %v1357_v26 }
 0x108   :  { %v90_v27 = vsel %vm89_vm4, %v1351_v3, %v86_v22  ;;  %v93_v28 = vmul.f32 %v1355_v21, %v92_v24  ;;  %vm247_vm13 = vmor %vm245_vm11, %vm246_vm12 }
 0x109   :  { %v363_v31 = vsel %vm51_vm0, %v361_v25, 0.0  ;;  %v101_v32 = vmul.f32 %v90_v27, %v1486_v20  ;;  %v233_v20 = vsub.f32 1.5, %v232_v33  ;;  %v241_v37 = vmul.f32 %v1357_v26, %v240_v34 }
 0x10a   :  { %364 = vadd.xlane.f32.xlu1 %v363_v31  ;;  %v94_v35 = vmul.f32 0.5, %v93_v28 }
 0x10b   :  { %1287 = vmatmul.msk.f32.vlgmr.msra.gmra.mxu0 %vm51_vm0, %v101_v32  ;;  %1289 = vmatmul.msk.f32.vlgmr.msra.gmra.mxu1 %vm51_vm0, %v101_v32 }
 0x10c   :  { %1291 = vmatmul.msk.f32.vlgmr.msra.gmra.mxu2 %vm51_vm0, %v101_v32  ;;  %1293 = vmatmul.msk.f32.vlgmr.msra.gmra.mxu3 %vm51_vm0, %v101_v32  ;;  %v95_v36 = vsub.f32 1.5, %v94_v35 }
 0x10d   :  { %413 = vmatpush.msra.mxu0 %v1523_v39  ;;  %436 = vmatpush.msra.mxu1 %v1528_v40 }
 0x10e   :  { %459 = vmatpush.msra.mxu2 %v1533_v41  ;;  %482 = vmatpush.msra.mxu3 %v1540_v42  ;;  %v96_v38 = vmul.f32 %v1355_v21, %v95_v36  ;;  %v234_v41 = vmul.f32 %v1645_v8, %v233_v20  ;;  %v242_v42 = vmul.f32 0.5, %v241_v37 }
 0x10f   :  { %414 = vmatpush.msra.mxu0 %v1547_v43  ;;  %437 = vmatpush.msra.mxu1 %v1552_v44 }
 0x110   :  { %460 = vmatpush.msra.mxu2 %v1557_v45  ;;  %483 = vmatpush.msra.mxu3 %v1564_v46  ;;  %v100_v39 = vsel %vm99_vm7, %v1355_v21, %v96_v38  ;;  %v238_v43 = vsel %vm237_vm10, %v1645_v8, %v234_v41 }
 0x111   :  { %415 = vmatpush.msra.mxu0 %v1571_v47  ;;  %438 = vmatpush.msra.mxu1 %v1576_v48  ;;  %v102_v40 = vmul.f32 %v100_v39, %v1498_v30  ;;  %v243_v30 = vsub.f32 1.5, %v242_v42  ;;  %v249_v44 = vmul.f32 %v238_v43, %v1484_v19 }
 0x112   :  { %461 = vmatpush.msra.mxu2 %v1581_v49  ;;  %484 = vmatpush.msra.mxu3 %v1588_v50 }
 0x113   :  { %416 = vmatpush.msra.mxu0 %v1595_v51  ;;  %439 = vmatpush.msra.mxu1 %v1600_v52  ;;  %v244_v45 = vmul.f32 %v1357_v26, %v243_v30 }
 0x114   :  { %1288 = vmatmul.msk.f32.gmra.mxu0 %vm51_vm0, %v102_v40  ;;  %1290 = vmatmul.msk.f32.gmra.mxu1 %vm51_vm0, %v102_v40 }
 0x115   :  { %1292 = vmatmul.msk.f32.gmra.mxu2 %vm51_vm0, %v102_v40  ;;  %1294 = vmatmul.msk.f32.gmra.mxu3 %vm51_vm0, %v102_v40  ;;  %v248_v46 = vsel %vm247_vm13, %v1357_v26, %v244_v45 }
 0x116   :  { %462 = vmatpush.msra.mxu2 %v1605_v53  ;;  %485 = vmatpush.msra.mxu3 %v1612_v54  ;;  %v250_v47 = vmul.f32 %v248_v46, %v1496_v29  ;;  %v1708_v29 = vld [vmem:[%s2156_s4] sm:$0xf] }
 0x117   :  { %v1711_v55 = vperm.slane %v1708_v29, 1  ;;  %v1717_v62 = vperm.slane %v1708_v29, 0  ;;  %v1722_v0 = vperm.slane %v1708_v29, 3  ;;  %v1772_v41 = vperm.slane %v1708_v29, 2 }
 0x11c   :  { %1295 = vmatmul.msk.f32.vlgmr.msrb.gmra.mxu0 %vm51_vm0, %v249_v44  ;;  %1297 = vmatmul.msk.f32.vlgmr.msrb.gmra.mxu1 %vm51_vm0, %v249_v44 }
 0x11d   :  { %1299 = vmatmul.msk.f32.vlgmr.msrb.gmra.mxu2 %vm51_vm0, %v249_v44  ;;  %1301 = vmatmul.msk.f32.vlgmr.msrb.gmra.mxu3 %vm51_vm0, %v249_v44 }
 0x124   :  { %1296 = vmatmul.msk.f32.gmra.mxu0 %vm51_vm0, %v250_v47  ;;  %1298 = vmatmul.msk.f32.gmra.mxu1 %vm51_vm0, %v250_v47 }
 0x125   :  { %1300 = vmatmul.msk.f32.gmra.mxu2 %vm51_vm0, %v250_v47  ;;  %1302 = vmatmul.msk.f32.gmra.mxu3 %vm51_vm0, %v250_v47 }
 0x174   :  { %v368_v19 = vpop.xlane.xlu2 %367 }
 0x175   :  { %v370_v48 = vmul.f32 %v368_v19, %v1480_v14 }
 0x177   :  { %v372_v49 = vadd.f32 1e-05, %v370_v48 }
 0x179   :  { %1358 = vrsqrt.f32 %v372_v49  ;;  %vm389_vm3 = vweird.f32 %v372_v49 }
 0x17d   :  { %v365_v50 = vpop.xlane.xlu1 %364 }
 0x17e   :  { %v369_v51 = vmul.f32 %v365_v50, %v1480_v14 }
 0x17f   :  { %v1359_v53 = vpop.eup %1358 }
 0x180   :  { %v371_v52 = vadd.f32 1e-05, %v369_v51  ;;  %v384_v54 = vmul.f32 %v1359_v53, %v372_v49  ;;  %vm390_vm4 = vweird.f32 %v1359_v53 }
 0x181   :  { %vm1744_vm5 = vmor %vm389_vm3, %vm390_vm4 }
 0x182   :  { %1360 = vrsqrt.f32 %v371_v52  ;;  %v385_v59 = vmul.f32 %v1359_v53, %v384_v54  ;;  %vm379_vm15 = vweird.f32 %v371_v52 }
 0x184   :  { %v386_v1 = vmul.f32 0.5, %v385_v59 }
 0x186   :  { %v387_v10 = vsub.f32 1.5, %v386_v1 }
 0x188   :  { %v1361_v56 = vpop.eup %1360  ;;  %v127_v57 = vpop.f32.mrf.mxu0  ;;  %v388_v25 = vmul.f32 %v1359_v53, %v387_v10 }
 0x189   :  { %v151_v58 = vpop.f32.mrf.mxu1  ;;  %v374_v60 = vmul.f32 %v1361_v56, %v371_v52  ;;  %vm380_vm1 = vweird.f32 %v1361_v56  ;;  %v1726_v5 = vadd.f32 %v127_v57, %v1717_v62 }
 0x18a   :  { %v1714_v61 = vadd.f32 %v151_v58, %v1711_v55  ;;  %vm381_vm2 = vmor %vm379_vm15, %vm380_vm1  ;;  %v392_v34 = vsel %vm1744_vm5, %v1359_v53, %v388_v25 }
 0x18b   :  { %v375_v14 = vmul.f32 %v1361_v56, %v374_v60  ;;  %v493_v21 = vmul.f32 %v1726_v5, %v1726_v5  ;;  %v394_v20 = vmul.f32 %v392_v34, %v1643_v7 }
 0x18c   :  { %v495_v63 = vmul.f32 %v1714_v61, %v1714_v61 }
 0x18d   :  { %v376_v2 = vmul.f32 0.5, %v375_v14 }
 0x18e   :  { %v508_v3 = vsel %vm501_vm14, %v495_v63, 0.0 }
 0x18f   :  { %509 = vadd.xlane.f32.xlu1 %v508_v3  ;;  %v377_v4 = vsub.f32 1.5, %v376_v2  ;;  %v175_v6 = vpop.f32.mrf.mxu2  ;;  %v199_v8 = vpop.f32.mrf.mxu3 }
 0x190   :  { %v1729_v9 = vadd.f32 %v199_v8, %v1722_v0  ;;  %v1797_v52 = vadd.f32 %v175_v6, %v1772_v41 }
 0x191   :  { %v378_v11 = vmul.f32 %v1361_v56, %v377_v4  ;;  %v1731_v12 = vpop.f32.mrf.mxu0  ;;  %v154_v13 = vpop.f32.mrf.mxu1 }
 0x192   :  { %v1734_v15 = vadd.f32 %v154_v13, %v1711_v55  ;;  %v499_v16 = vmul.f32 %v1729_v9, %v1729_v9  ;;  %v497_v58 = vmul.f32 %v1797_v52, %v1797_v52  ;;  %v1811_v59 = vadd.f32 %v1731_v12, %v1717_v62 }
 0x193   :  { %v382_v17 = vsel %vm381_vm2, %v1361_v56, %v378_v11 }
 0x194   :  { %v393_v22 = vmul.f32 %v382_v17, %v1655_v18  ;;  %v520_v23 = vsel %vm501_vm14, %v499_v16, 0.0  ;;  %v496_v24 = vmul.f32 %v1734_v15, %v1734_v15  ;;  %v502_v18 = vsel %vm501_vm14, %v493_v21, 0.0 }
 0x195   :  { %521 = vadd.xlane.f32.xlu0 %v520_v23  ;;  %v514_v1 = vsel %vm501_vm14, %v497_v58, 0.0  ;;  %v494_v3 = vmul.f32 %v1811_v59, %v1811_v59 }
 0x196   :  { %1305 = vmatmul.msk.f32.vlgmr.msra.gmra.mxu1 %vm51_vm0, %v393_v22  ;;  %1307 = vmatmul.msk.f32.vlgmr.msra.gmra.mxu2 %vm51_vm0, %v393_v22  ;;  %v511_v27 = vsel %vm501_vm14, %v496_v24, 0.0 }
 0x197   :  { %1309 = vmatmul.msk.f32.vlgmr.msra.gmra.mxu3 %vm51_vm0, %v393_v22  ;;  %512 = vadd.xlane.f32.xlu2 %v511_v27  ;;  %v505_v11 = vsel %vm501_vm14, %v494_v3, 0.0 }
 0x198   :  { %v178_v28 = vpop.f32.mrf.mxu2  ;;  %v202_v31 = vpop.f32.mrf.mxu3  ;;  %1303 = vmatmul.msk.f32.vlgmr.msra.gmra.mxu0 %vm51_vm0, %v393_v22  ;;  %503 = vadd.xlane.f32.xlu1 %v502_v18 }
 0x199   :  { %v274_v32 = vpop.f32.mrf.mxu0  ;;  %v297_v33 = vpop.f32.mrf.mxu1  ;;  %v1814_v60 = vadd.f32 %v202_v31, %v1722_v0  ;;  %v1824_v6 = vadd.f32 %v178_v28, %v1772_v41 }
 0x19a   :  { %v1757_v35 = vadd.f32 %v274_v32, %v1717_v62  ;;  %v1760_v36 = vadd.f32 %v297_v33, %v1711_v55 }
 0x19b   :  { %v500_v2 = vmul.f32 %v1814_v60, %v1814_v60  ;;  %v498_v13 = vmul.f32 %v1824_v6, %v1824_v6 }
 0x19c   :  { %v624_v37 = vmul.f32 %v1760_v36, %v1760_v36  ;;  %v622_v38 = vmul.f32 %v1757_v35, %v1757_v35 }
 0x19d   :  { %v523_v10 = vsel %vm501_vm14, %v500_v2, 0.0  ;;  %v517_v17 = vsel %vm501_vm14, %v498_v13, 0.0 }
 0x19e   :  { %1306 = vmatmul.msk.f32.gmra.mxu1 %vm51_vm0, %v394_v20  ;;  %1308 = vmatmul.msk.f32.gmra.mxu2 %vm51_vm0, %v394_v20  ;;  %v636_v39 = vsel %vm501_vm14, %v624_v37, 0.0  ;;  %v630_v40 = vsel %vm501_vm14, %v622_v38, 0.0 }
 0x19f   :  { %1310 = vmatmul.msk.f32.gmra.mxu3 %vm51_vm0, %v394_v20  ;;  %637 = vadd.xlane.f32.xlu0 %v636_v39 }
 0x1a0   :  { %v320_v7 = vpop.f32.mrf.mxu2  ;;  %v343_v42 = vpop.f32.mrf.mxu3  ;;  %1304 = vmatmul.msk.f32.gmra.mxu0 %vm51_vm0, %v394_v20  ;;  %631 = vadd.xlane.f32.xlu1 %v630_v40 }
 0x1a1   :  { %v1777_v30 = vadd.f32 %v320_v7, %v1772_v41  ;;  %v1780_v43 = vadd.f32 %v343_v42, %v1722_v0  ;;  %v300_v44 = vpop.f32.mrf.mxu1  ;;  %v277_v46 = vpop.f32.mrf.mxu0 }
 0x1a2   :  { %v1783_v45 = vadd.f32 %v300_v44, %v1711_v55  ;;  %v1792_v49 = vadd.f32 %v277_v46, %v1717_v62 }
 0x1a3   :  { %v628_v47 = vmul.f32 %v1780_v43, %v1780_v43  ;;  %v626_v19 = vmul.f32 %v1777_v30, %v1777_v30 }
 0x1a4   :  { %v625_v48 = vmul.f32 %v1783_v45, %v1783_v45  ;;  %v623_v56 = vmul.f32 %v1792_v49, %v1792_v49 }
 0x1a5   :  { %v648_v50 = vsel %vm501_vm14, %v628_v47, 0.0  ;;  %v642_v53 = vsel %vm501_vm14, %v626_v19, 0.0 }
 0x1a6   :  { %v639_v51 = vsel %vm501_vm14, %v625_v48, 0.0  ;;  %v633_v63 = vsel %vm501_vm14, %v623_v56, 0.0 }
 0x1a7   :  { %649 = vadd.xlane.f32.xlu0 %v648_v50  ;;  %640 = vadd.xlane.f32.xlu2 %v639_v51 }
 0x1a8   :  { %v346_v29 = vpop.f32.mrf.mxu3  ;;  %643 = vadd.xlane.f32.xlu1 %v642_v53  ;;  %v323_v4 = vpop.f32.mrf.mxu2 }
 0x1a9   :  { %v1801_v54 = vadd.f32 %v346_v29, %v1722_v0  ;;  %v1827_v8 = vadd.f32 %v323_v4, %v1772_v41 }
 0x1ab   :  { %v629_v57 = vmul.f32 %v1801_v54, %v1801_v54  ;;  %v627_v12 = vmul.f32 %v1827_v8, %v1827_v8 }
 0x1ad   :  { %v651_v14 = vsel %vm501_vm14, %v629_v57, 0.0  ;;  %v645_v16 = vsel %vm501_vm14, %v627_v12, 0.0 }
 0x1af   :  { %652 = vadd.xlane.f32.xlu2 %v651_v14  ;;  %634 = vadd.xlane.f32.xlu0 %v633_v63 }
 0x1b0   :  { %515 = vadd.xlane.f32.xlu1 %v514_v1 }
 0x1b7   :  { %524 = vadd.xlane.f32.xlu2 %v523_v10  ;;  %506 = vadd.xlane.f32.xlu0 %v505_v11 }
 0x1bf   :  { %646 = vadd.xlane.f32.xlu2 %v645_v16  ;;  %518 = vadd.xlane.f32.xlu0 %v517_v17 }
 0x202   :  { %v510_v21 = vpop.xlane.xlu1 %509 }
 0x203   :  { %v528_v22 = vadd.f32 1e-12, %v510_v21 }
 0x205   :  { %1362 = vrsqrt.f32 %v528_v22  ;;  %vm560_vm7 = vweird.f32 %v528_v22 }
 0x208   :  { %v522_v23 = vpop.xlane.xlu0 %521 }
 0x209   :  { %v1837_v24 = vadd.f32 1e-12, %v522_v23 }
 0x20a   :  { %v513_v26 = vpop.xlane.xlu2 %512 }
 0x20b   :  { %v1363_v25 = vpop.eup %1362  ;;  %1364 = vrsqrt.f32 %v1837_v24  ;;  %v504_v18 = vpop.xlane.xlu1 %503  ;;  %v1840_v28 = vadd.f32 1e-12, %v513_v26  ;;  %vm600_vm9 = vweird.f32 %v1837_v24 }
 0x20c   :  { %v555_v27 = vmul.f32 %v1363_v25, %v528_v22  ;;  %v1842_v31 = vadd.f32 1e-12, %v504_v18  ;;  %vm561_vm6 = vweird.f32 %v1363_v25 }
 0x20d   :  { %1366 = vrsqrt.f32 %v1840_v28  ;;  %vm1871_vm8 = vmor %vm560_vm7, %vm561_vm6  ;;  %vm570_vm10 = vweird.f32 %v1840_v28 }
 0x20e   :  { %v556_v32 = vmul.f32 %v1363_v25, %v555_v27  ;;  %1368 = vrsqrt.f32 %v1842_v31  ;;  %vm540_vm11 = vweird.f32 %v1842_v31 }
 0x210   :  { %v557_v34 = vmul.f32 0.5, %v556_v32 }
 0x211   :  { %v1846_v33 = vpop.eup %1364 }
 0x212   :  { %v595_v20 = vmul.f32 %v1846_v33, %v1837_v24  ;;  %v638_v37 = vpop.xlane.xlu0 %637  ;;  %v558_v44 = vsub.f32 1.5, %v557_v34  ;;  %vm601_vm12 = vweird.f32 %v1846_v33 }
 0x213   :  { %v1850_v38 = vadd.f32 1e-12, %v638_v37  ;;  %v632_v39 = vpop.xlane.xlu1 %631  ;;  %v1852_v40 = vpop.eup %1366  ;;  %vm1913_vm3 = vmor %vm600_vm9, %vm601_vm12 }
 0x214   :  { %v1854_v7 = vadd.f32 1e-12, %v632_v39  ;;  %v1856_v42 = vpop.eup %1368  ;;  %v596_v46 = vmul.f32 %v1846_v33, %v595_v20  ;;  %v565_v47 = vmul.f32 %v1852_v40, %v1840_v28  ;;  %v559_v51 = vmul.f32 %v1363_v25, %v558_v44  ;;  %v441_v29 = vpop.f32.mrf.mxu1 }
 0x215   :  { %1370 = vrsqrt.f32 %v1850_v38  ;;  %v535_v19 = vmul.f32 %v1856_v42, %v1842_v31  ;;  %v1890_v17 = vadd.f32 %v441_v29, %v1711_v55  ;;  %vm571_vm13 = vweird.f32 %v1852_v40  ;;  %v418_v37 = vpop.f32.mrf.mxu0 }
 0x216   :  { %v566_v48 = vmul.f32 %v1852_v40, %v565_v47  ;;  %1372 = vrsqrt.f32 %v1854_v7  ;;  %v597_v53 = vmul.f32 0.5, %v596_v46  ;;  %v563_v11 = vsel %vm1871_vm8, %v1363_v25, %v559_v51  ;;  %vm1926_vm5 = vmor %vm570_vm10, %vm571_vm13 }
 0x217   :  { %v536_v50 = vmul.f32 %v1856_v42, %v535_v19  ;;  %v1897_v26 = vmul.f32 %v563_v11, %v1714_v61  ;;  %vm541_vm15 = vweird.f32 %v1856_v42  ;;  %vm688_vm1 = vweird.f32 %v1850_v38 }
 0x218   :  { %v567_v58 = vmul.f32 0.5, %v566_v48  ;;  %v598_v12 = vsub.f32 1.5, %v597_v53  ;;  %vm668_vm4 = vweird.f32 %v1854_v7  ;;  %v1939_v28 = vadd.f32 %v418_v37, %v1717_v62  ;;  %vm1953_vm8 = vmor %vm540_vm11, %vm541_vm15 }
 0x219   :  { %v537_v14 = vmul.f32 0.5, %v536_v50 }
 0x21a   :  { %v650_v56 = vpop.xlane.xlu0 %649  ;;  %v641_v1 = vpop.xlane.xlu2 %640  ;;  %v568_v21 = vsub.f32 1.5, %v567_v58  ;;  %v599_v32 = vmul.f32 %v1846_v33, %v598_v12 }
 0x21b   :  { %v1867_v57 = vpop.eup %1370  ;;  %v1869_v63 = vadd.f32 1e-12, %v650_v56  ;;  %v644_v2 = vpop.xlane.xlu1 %643  ;;  %v538_v22 = vsub.f32 1.5, %v537_v14  ;;  %v1892_v23 = vadd.f32 1e-12, %v641_v1 }
 0x21c   :  { %v683_v4 = vmul.f32 %v1867_v57, %v1850_v38  ;;  %v1879_v10 = vpop.eup %1372  ;;  %v1894_v25 = vadd.f32 1e-12, %v644_v2  ;;  %vm689_vm2 = vweird.f32 %v1867_v57  ;;  %v569_v46 = vmul.f32 %v1852_v40, %v568_v21  ;;  %v487_v29 = vpop.f32.mrf.mxu3 }
 0x21d   :  { %1374 = vrsqrt.f32 %v1869_v63  ;;  %v663_v16 = vmul.f32 %v1879_v10, %v1854_v7  ;;  %v539_v47 = vmul.f32 %v1856_v42, %v538_v22  ;;  %vm669_vm6 = vweird.f32 %v1879_v10  ;;  %vm690_vm7 = vmor %vm688_vm1, %vm689_vm2 }
 0x21e   :  { %v684_v13 = vmul.f32 %v1867_v57, %v683_v4  ;;  %1376 = vrsqrt.f32 %v1892_v23  ;;  %v603_v1 = vsel %vm1913_vm3, %v1846_v33, %v599_v32  ;;  %v573_v33 = vsel %vm1926_vm5, %v1852_v40, %v569_v46  ;;  %vm670_vm9 = vmor %vm668_vm4, %vm669_vm6 }
 0x21f   :  { %v664_v18 = vmul.f32 %v1879_v10, %v663_v16  ;;  %1378 = vrsqrt.f32 %v1894_v25  ;;  %v1971_v31 = vadd.f32 %v487_v29, %v1722_v0  ;;  %v1983_v7 = vmul.f32 %v603_v1, %v1729_v9 }
 0x220   :  { %v685_v27 = vmul.f32 0.5, %v684_v13  ;;  %v543_v13 = vsel %vm1953_vm8, %v1856_v42, %v539_v47  ;;  %vm728_vm10 = vweird.f32 %v1869_v63  ;;  %v1996_v9 = vmul.f32 %v573_v33, %v1734_v15 }
 0x221   :  { %v665_v20 = vmul.f32 0.5, %v664_v18  ;;  %vm698_vm12 = vweird.f32 %v1892_v23  ;;  %vm708_vm2 = vweird.f32 %v1894_v25 }
 0x222   :  { %v686_v34 = vsub.f32 1.5, %v685_v27  ;;  %v635_v61 = vpop.xlane.xlu0 %634  ;;  %v653_v19 = vpop.xlane.xlu2 %652 }
 0x223   :  { %v1907_v39 = vpop.eup %1374  ;;  %v1920_v48 = vadd.f32 1e-12, %v635_v61  ;;  %v516_v50 = vpop.xlane.xlu1 %515  ;;  %v666_v53 = vsub.f32 1.5, %v665_v20  ;;  %v1941_v58 = vadd.f32 1e-12, %v653_v19 }
 0x224   :  { %v687_v51 = vmul.f32 %v1867_v57, %v686_v34  ;;  %v723_v56 = vmul.f32 %v1907_v39, %v1869_v63  ;;  %v1944_v14 = vadd.f32 1e-12, %v516_v50  ;;  %v1960_v11 = vpop.eup %1376  ;;  %vm729_vm11 = vweird.f32 %v1907_v39 }
 0x225   :  { %1380 = vrsqrt.f32 %v1920_v48  ;;  %v667_v3 = vmul.f32 %v1879_v10, %v666_v53  ;;  %vm730_vm13 = vmor %vm728_vm10, %vm729_vm11  ;;  %vm699_vm15 = vweird.f32 %v1960_v11  ;;  %vm678_vm4 = vweird.f32 %v1920_v48 }
 0x226   :  { %v691_v2 = vsel %vm690_vm7, %v1867_v57, %v687_v51  ;;  %v724_v4 = vmul.f32 %v1907_v39, %v723_v56  ;;  %1382 = vrsqrt.f32 %v1941_v58  ;;  %v1974_v57 = vpop.eup %1378  ;;  %vm700_vm3 = vmor %vm698_vm12, %vm699_vm15  ;;  %vm738_vm8 = vweird.f32 %v1941_v58 }
 0x227   :  { %v744_v12 = vmul.f32 %v691_v2, %v1760_v36  ;;  %v671_v40 = vsel %vm670_vm9, %v1879_v10, %v667_v3  ;;  %v693_v36 = vmul.f32 %v1960_v11, %v1892_v23  ;;  %v703_v22 = vmul.f32 %v1974_v57, %v1894_v25 }
 0x228   :  { %v725_v16 = vmul.f32 0.5, %v724_v4  ;;  %v742_v21 = vmul.f32 %v671_v40, %v1757_v35  ;;  %1384 = vrsqrt.f32 %v1944_v14  ;;  %v614_v35 = vmul.f32 %v543_v13, %v1726_v5 }
 0x229   :  { %1315 = vmatpush.xpose.msk.msrb.mxu2 %vm501_vm14, %v744_v12  ;;  %v694_v42 = vmul.f32 %v1960_v11, %v693_v36  ;;  %v704_v32 = vmul.f32 %v1974_v57, %v703_v22  ;;  %vm709_vm1 = vweird.f32 %v1974_v57  ;;  %vm580_vm12 = vweird.f32 %v1944_v14 }
 0x22a   :  { %v726_v27 = vsub.f32 1.5, %v725_v16  ;;  %v507_v10 = vpop.xlane.xlu0 %506  ;;  %1311 = vmatpush.xpose.msk.msrb.mxu0 %vm501_vm14, %v742_v21  ;;  %v525_v34 = vpop.xlane.xlu2 %524  ;;  %vm710_vm6 = vmor %vm708_vm2, %vm709_vm1 }
 0x22b   :  { %v1993_v18 = vpop.eup %1380  ;;  %v2001_v20 = vadd.f32 1e-12, %v507_v10  ;;  %v695_v61 = vmul.f32 0.5, %v694_v42  ;;  %v705_v5 = vmul.f32 0.5, %v704_v32  ;;  %v2016_v46 = vadd.f32 1e-12, %v525_v34  ;;  %v444_v21 = vpop.f32.mrf.mxu1 }
 0x22c   :  { %v727_v37 = vmul.f32 %v1907_v39, %v726_v27  ;;  %v673_v44 = vmul.f32 %v1993_v18, %v1920_v48  ;;  %1316 = vmatmul.msk.f32.vlgmr.msrb.gmra.mxu2 %vm501_vm14, %v1897_v26  ;;  %v2009_v15 = vpop.eup %1382  ;;  %vm679_vm5 = vweird.f32 %v1993_v18  ;;  %v445_v32 = vadd.f32 %v444_v21, %v1711_v55 }
 0x22d   :  { %1386 = vrsqrt.f32 %v2001_v20  ;;  %v696_v19 = vsub.f32 1.5, %v695_v61  ;;  %v733_v26 = vmul.f32 %v2009_v15, %v1941_v58  ;;  %1312 = vmatmul.msk.f32.vlgmr.msrb.gmra.mxu0 %vm501_vm14, %v614_v35  ;;  %v706_v24 = vsub.f32 1.5, %v705_v5  ;;  %vm680_vm9 = vmor %vm678_vm4, %vm679_vm5  ;;  %v464_v35 = vpop.f32.mrf.mxu2 }
 0x22e   :  { %v731_v47 = vsel %vm730_vm13, %v1907_v39, %v727_v37  ;;  %v2024_v50 = vpop.eup %1384  ;;  %v674_v51 = vmul.f32 %v1993_v18, %v673_v44  ;;  %1388 = vrsqrt.f32 %v2016_v46  ;;  %vm739_vm7 = vweird.f32 %v2009_v15 }
 0x22f   :  { %v748_v63 = vmul.f32 %v731_v47, %v1780_v43  ;;  %v697_v53 = vmul.f32 %v1960_v11, %v696_v19  ;;  %v734_v39 = vmul.f32 %v2009_v15, %v733_v26  ;;  %v575_v29 = vmul.f32 %v2024_v50, %v1944_v14  ;;  %vm740_vm11 = vmor %vm738_vm8, %vm739_vm7  ;;  %v490_v19 = vpop.f32.mrf.mxu3 }
 0x230   :  { %v707_v43 = vmul.f32 %v1974_v57, %v706_v24  ;;  %v675_v56 = vmul.f32 0.5, %v674_v51  ;;  %vm581_vm10 = vweird.f32 %v2024_v50  ;;  %vm550_vm2 = vweird.f32 %v2001_v20 }
 0x231   :  { %1323 = vmatpush.xpose.msk.msra.mxu2 %vm501_vm14, %v748_v63  ;;  %v701_v25 = vsel %vm700_vm3, %v1960_v11, %v697_v53  ;;  %v735_v1 = vmul.f32 0.5, %v734_v39  ;;  %v576_v23 = vmul.f32 %v2024_v50, %v575_v29  ;;  %vm582_vm13 = vmor %vm580_vm12, %vm581_vm10  ;;  %vm610_vm3 = vweird.f32 %v2016_v46 }
 0x232   :  { %v519_v38 = vpop.xlane.xlu0 %518  ;;  %v745_v3 = vmul.f32 %v701_v25, %v1783_v45  ;;  %v711_v4 = vsel %vm710_vm6, %v1974_v57, %v707_v43  ;;  %v676_v33 = vsub.f32 1.5, %v675_v56  ;;  %v647_v12 = vpop.xlane.xlu2 %646  ;;  %v491_v53 = vadd.f32 %v490_v19, %v1722_v0 }
 0x233   :  { %v2048_v2 = vpop.eup %1386  ;;  %v2052_v11 = vadd.f32 1e-12, %v519_v38  ;;  %v746_v13 = vmul.f32 %v711_v4, %v1777_v30  ;;  %v736_v40 = vsub.f32 1.5, %v735_v1  ;;  %v577_v16 = vmul.f32 0.5, %v576_v23 }
 0x234   :  { %v545_v36 = vmul.f32 %v2048_v2, %v2001_v20  ;;  %1324 = vmatmul.msk.f32.vlgmr.msra.gmra.mxu2 %vm501_vm14, %v1983_v7  ;;  %v677_v45 = vmul.f32 %v1993_v18, %v676_v33  ;;  %1317 = vmatpush.xpose.msk.msrb.mxu3 %vm501_vm14, %v745_v3  ;;  %v2062_v57 = vadd.f32 1e-12, %v647_v12  ;;  %vm551_vm15 = vweird.f32 %v2048_v2 }
 0x235   :  { %1022 = vmatpush.msrb.mxu2 %v1890_v17  ;;  %v1389_v17 = vpop.eup %1388  ;;  %1390 = vrsqrt.f32 %v2052_v11  ;;  %v737_v30 = vmul.f32 %v2009_v15, %v736_v40  ;;  %v578_v7 = vsub.f32 1.5, %v577_v16  ;;  %1319 = vmatpush.xpose.msk.msra.mxu0 %vm501_vm14, %v746_v13  ;;  %vm552_vm4 = vmor %vm550_vm2, %vm551_vm15  ;;  %vm590_vm10 = vweird.f32 %v2052_v11  ;;  %v467_v23 = vpop.f32.mrf.mxu2  ;;  %v45_v13 = vld [vmem:[%s2157_s5 + $0x8] sm:$0xff]  ;;  %v46_v40 = vld [vmem:[%s2157_s5 + $0x10] sm:$0xff] }
 0x236   :  { %v605_v58 = vmul.f32 %v1389_v17, %v2016_v46  ;;  %v546_v22 = vmul.f32 %v2048_v2, %v545_v36  ;;  %1392 = vrsqrt.f32 %v2062_v57  ;;  %vm611_vm1 = vweird.f32 %v1389_v17  ;;  %v47_v16 = vld [vmem:[%s2157_s5 + $0x18] sm:$0xff] }
 0x237   :  { %1114 = vmatpush.msra.mxu2 %v1971_v31  ;;  %v681_v31 = vsel %vm680_vm9, %v1993_v18, %v677_v45  ;;  %v741_v48 = vsel %vm740_vm11, %v2009_v15, %v737_v30  ;;  %v579_v42 = vmul.f32 %v2024_v50, %v578_v7  ;;  %1318 = vmatmul.msk.f32.vlgmr.msrb.gmra.mxu3 %vm501_vm14, %v1996_v9  ;;  %vm612_vm5 = vmor %vm610_vm3, %vm611_vm1  ;;  %vm718_vm8 = vweird.f32 %v2062_v57 }
 0x238   :  { %v743_v27 = vmul.f32 %v681_v31, %v1792_v49  ;;  %v606_v10 = vmul.f32 %v1389_v17, %v605_v58  ;;  %v749_v18 = vmul.f32 %v741_v48, %v1801_v54  ;;  %v547_v14 = vmul.f32 0.5, %v546_v22 }
 0x239   :  { %976 = vmatpush.msrb.mxu0 %v1939_v28  ;;  %v583_v28 = vsel %vm582_vm13, %v2024_v50, %v579_v42  ;;  %v465_v54 = vadd.f32 %v464_v35, %v1772_v41 }
 0x23a   :  { %v607_v34 = vmul.f32 0.5, %v606_v10  ;;  %1313 = vmatpush.xpose.msk.msrb.mxu1 %vm501_vm14, %v743_v27  ;;  %v618_v37 = vmul.f32 %v583_v28, %v1797_v52  ;;  %v548_v61 = vsub.f32 1.5, %v547_v14  ;;  %1325 = vmatpush.xpose.msk.msra.mxu3 %vm501_vm14, %v749_v18  ;;  %v1347_v10 = vld [vmem:[%s2158_s6] ss:$0 sm:$0xff]  ;;  %s1422_s6 = smov 128  }
 0x23b   :  { %v1391_v49 = vpop.eup %1390 }
 0x23c   :  { %v608_v9 = vsub.f32 1.5, %v607_v34  ;;  %v585_v44 = vmul.f32 %v1391_v49, %v2052_v11  ;;  %v1393_v55 = vpop.eup %1392  ;;  %v549_v15 = vmul.f32 %v2048_v2, %v548_v61  ;;  %1320 = vmatmul.msk.f32.vlgmr.msra.gmra.mxu0 %vm501_vm14, %v618_v37  ;;  %vm591_vm7 = vweird.f32 %v1391_v49  ;;  %v44_v11 = vld [vmem:[%s2157_s5] sm:$0xff] }
 0x23d   :  { %v713_v5 = vmul.f32 %v1393_v55, %v2062_v57  ;;  %1068 = vmatpush.msra.mxu0 %v465_v54  ;;  %vm719_vm6 = vweird.f32 %v1393_v55  ;;  %vm592_vm11 = vmor %vm590_vm10, %vm591_vm7 }
 0x23e   :  { %1045 = vmatpush.msrb.mxu3 %v445_v32  ;;  %v609_v52 = vmul.f32 %v1389_v17, %v608_v9  ;;  %v586_v47 = vmul.f32 %v1391_v49, %v585_v44  ;;  %v553_v26 = vsel %vm552_vm4, %v2048_v2, %v549_v15  ;;  %vm720_vm9 = vmor %vm718_vm8, %vm719_vm6  ;;  %v468_v2 = vadd.f32 %v467_v23, %v1772_v41 }
 0x23f   :  { %v615_v63 = vmul.f32 %v553_v26, %v1811_v59  ;;  %v714_v24 = vmul.f32 %v1393_v55, %v713_v5  ;;  %v421_v59 = vpop.f32.mrf.mxu0 }
 0x240   :  { %v613_v50 = vsel %vm612_vm5, %v1389_v17, %v609_v52  ;;  %v587_v51 = vmul.f32 0.5, %v586_v47  ;;  %v422_v1 = vadd.f32 %v421_v59, %v1717_v62 }
 0x241   :  { %v621_v20 = vmul.f32 %v613_v50, %v1814_v60  ;;  %v715_v39 = vmul.f32 0.5, %v714_v24  ;;  %1314 = vmatmul.msk.f32.vlgmr.msrb.gmra.mxu1 %vm501_vm14, %v615_v63 }
 0x242   :  { %v588_v46 = vsub.f32 1.5, %v587_v51 }
 0x243   :  { %1326 = vmatmul.msk.f32.vlgmr.msra.gmra.mxu3 %vm501_vm14, %v621_v20  ;;  %v716_v29 = vsub.f32 1.5, %v715_v39 }
 0x244   :  { %1137 = vmatpush.msra.mxu3 %v491_v53  ;;  %v589_v43 = vmul.f32 %v1391_v49, %v588_v46 }
 0x245   :  { %v717_v56 = vmul.f32 %v1393_v55, %v716_v29 }
 0x246   :  { %v593_v25 = vsel %vm592_vm11, %v1391_v49, %v589_v43 }
 0x247   :  { %v721_v60 = vsel %vm720_vm9, %v1393_v55, %v717_v56  ;;  %v619_v38 = vmul.f32 %v593_v25, %v1824_v6 }
 0x248   :  { %v747_v0 = vmul.f32 %v721_v60, %v1827_v8 }
 0x24a   :  { %1321 = vmatpush.xpose.msk.msra.mxu1 %vm501_vm14, %v747_v0 }
 0x24d   :  { %1322 = vmatmul.msk.f32.vlgmr.msra.gmra.mxu1 %vm501_vm14, %v619_v38 }
 0x24e   :  { %999 = vmatpush.msrb.mxu1 %v422_v1 }
 0x250   :  { %1091 = vmatpush.msra.mxu1 %v468_v2 }
 0x2aa   :  { %v773_v3 = vpop.f32.mrf.mxu0 }
 0x2ab   :  { %1327 = vmatmul.msk.f32.vlgmr.msrb.gmra.mxu0 %vm501_vm14, %v773_v3 }
 0x2ac   :  { %1163 = vmatpush.msrb.mxu0 %v45_v13 }
 0x2af   :  { %v825_v4 = vpop.f32.mrf.mxu2 }
 0x2b0   :  { %1329 = vmatmul.msk.f32.vlgmr.msrb.gmra.mxu2 %vm501_vm14, %v825_v4 }
 0x2b1   :  { %1221 = vmatpush.msrb.mxu2 %v46_v40 }
 0x2b7   :  { %v929_v8 = vpop.f32.mrf.mxu2 }
 0x2b8   :  { %1333 = vmatmul.msk.f32.vlgmr.msra.gmra.mxu2 %vm501_vm14, %v929_v8 }
 0x2b9   :  { %v877_v62 = vpop.f32.mrf.mxu0 }
 0x2ba   :  { %v851_v33 = vpop.f32.mrf.mxu3  ;;  %1331 = vmatmul.msk.f32.vlgmr.msra.gmra.mxu0 %vm501_vm14, %v877_v62 }
 0x2bb   :  { %1330 = vmatmul.msk.f32.vlgmr.msrb.gmra.mxu3 %vm501_vm14, %v851_v33 }
 0x2bc   :  { %1252 = vmatpush.msrb.mxu3 %v47_v16 }
 0x2be   :  { %v799_v6 = vpop.f32.mrf.mxu1 }
 0x2bf   :  { %1328 = vmatmul.msk.f32.vlgmr.msrb.gmra.mxu1 %vm501_vm14, %v799_v6 }
 0x2c0   :  { %1192 = vmatpush.msrb.mxu1 %v44_v11 }
 0x2c6   :  { %v955_v41 = vpop.f32.mrf.mxu3 }
 0x2c7   :  { %1334 = vmatmul.msk.f32.vlgmr.msra.gmra.mxu3 %vm501_vm14, %v955_v41 }
 0x2ca   :  { %v903_v12 = vpop.f32.mrf.mxu1 }
 0x2cb   :  { %1332 = vmatmul.msk.f32.vlgmr.msra.gmra.mxu1 %vm501_vm14, %v903_v12 }
 0x328   :  { %v978_v36 = vpop.f32.mrf.mxu0 }
 0x329   :  { %1337 = vmatmul.msk.f32.vlgmr.msrb.gmra.mxu1 %vm501_vm14, %v978_v36 }
 0x333   :  { %v1024_v17 = vpop.f32.mrf.mxu2 }
 0x334   :  { %1335 = vmatmul.msk.f32.vlgmr.msrb.gmra.mxu0 %vm501_vm14, %v1024_v17 }
 0x337   :  { %v1070_v45 = vpop.f32.mrf.mxu0 }
 0x338   :  { %1339 = vmatmul.msk.f32.vlgmr.msrb.gmra.mxu2 %vm501_vm14, %v1070_v45 }
 0x33b   :  { %v1116_v57 = vpop.f32.mrf.mxu2 }
 0x33c   :  { %1341 = vmatmul.msk.f32.vlgmr.msrb.gmra.mxu3 %vm501_vm14, %v1116_v57  ;;  %v1001_v30 = vpop.f32.mrf.mxu1 }
 0x33d   :  { %1338 = vmatmul.msk.f32.gmra.mxu1 %vm501_vm14, %v1001_v30 }
 0x33e   :  { %v1047_v7 = vpop.f32.mrf.mxu3 }
 0x33f   :  { %1336 = vmatmul.msk.f32.gmra.mxu0 %vm501_vm14, %v1047_v7 }
 0x348   :  { %v1093_v58 = vpop.f32.mrf.mxu1 }
 0x349   :  { %1340 = vmatmul.msk.f32.gmra.mxu2 %vm501_vm14, %v1093_v58 }
 0x34a   :  { %v1139_v21 = vpop.f32.mrf.mxu3 }
 0x34b   :  { %1342 = vmatmul.msk.f32.gmra.mxu3 %vm501_vm14, %v1139_v21 }
 0x3a6   :  { %v1194_v22 = vpop.f32.mrf.mxu1 }
 0x3b1   :  { %v1165_v31 = vpop.f32.mrf.mxu0 }
 0x3b2   :  { %v1195_v48 = vadd.f32 %v1194_v22, %v1165_v31 }
 0x3ba   :  { %v1197_v28 = vpop.f32.mrf.mxu1 }
 0x3bb   :  { %v1223_v27 = vpop.f32.mrf.mxu2 }
 0x3bc   :  { %v1229_v42 = vadd.f32 %v1223_v27, %v1195_v48  ;;  %v1168_v32 = vpop.f32.mrf.mxu0 }
 0x3bd   :  { %v1198_v34 = vadd.f32 %v1197_v28, %v1168_v32 }
 0x3bf   :  { %v1254_v35 = vpop.f32.mrf.mxu3 }
 0x3c0   :  { %v1260_v18 = vadd.f32 %v1254_v35, %v1229_v42 }
 0x3c2   :  { %v1265_v14 = vadd.f32 %v1347_v10, %v1260_v18 }
 0x3c4   :  { %1267 = vst.msk [vmem:[#allocation2] sm:$0xff] %vm51_vm0, %v1265_v14 }
 0x3cc   :  { %v1226_v49 = vpop.f32.mrf.mxu2 }
 0x3cd   :  { %v1230_v37 = vadd.f32 %v1226_v49, %v1198_v34 }
 0x3ce   :  { %v1257_v61 = vpop.f32.mrf.mxu3 }
 0x3cf   :  { %v1261_v54 = vadd.f32 %v1257_v61, %v1230_v37 }
 0x3d1   :  { %v1266_v9 = vadd.f32 %v1347_v10, %v1261_v54 }
 0x3d3   :  { %1268 = vst.msk [vmem:[#allocation2 + $0x8] sm:$0xff] %vm51_vm0, %v1266_v9 }
 0x3d4   :  { %1281 = dma.vmem_to_hbm [thread:$0]  %s1274_s26, 256, %s1276_s29, [#allocation3], %s1422_s6, %s1422_s6, %s1423_s30  }
 0x3d5   :  { %1418 = dma.done.wait [#allocation3], 256  }
 0x3d6   :  { %1419 = vsyncadd [#allocation3], 4294967040 }
 0x3d7   :  { %1286 = vsyncpa [#allocation3], 1 }

</bundles_post_ra>
